<compile_context>
chip_gen: v7x
topology: tpu7x:2x2x1
jax: 0.10.0
libtpu: 0.0.40
codegen_flags: <defaults>
</compile_context>

<pallas_src>
import math

import jax
import jax.numpy as jnp
from jax.experimental import pallas as pl
from jax.experimental.pallas import tpu as pltpu

LANE = 128
SUBLANE_BF16 = 16


def _round_up(v, m):
    return (v + m - 1) // m * m


def _pad2(a, rows, cols):
    r, c = a.shape
    if r == rows and c == cols:
        return a
    return jnp.pad(a, ((0, rows - r), (0, cols - c)))


def _pick_tiles(n):
    """Default query / key row tiles.

    tq: 16-row multiples (bf16 packing), capped at 256, prefer >=2 tiles (megacore).
    tk: lane dim of the Kt blocks -> multiple of 128, capped at 512 (MXU fill on v6e/v7x
        without blowing up the [tq, tk] f32 score tile)."""
    tq = n
    for cand in (256, 128, 64, 32, 16):
        if n % cand == 0 and n // cand >= 2:
            tq = cand
            break
    tk = n
    for cand in (512, 384, 256, 128):
        if n % cand == 0:
            tk = cand
            break
    return tq, tk


def _gat_kernel(q_ref, kt_ref, v_ref, xs_ref, wo_ref, bo_ref,
                w1_ref, b1_ref, w2_ref, b2_ref, out_ref,
                m_sc, l_sc, acc_sc):
    kb = pl.program_id(1)

    @pl.when(kb == 0)
    def _init():
        m_sc[...] = jnp.full(m_sc.shape, -jnp.inf, dtype=m_sc.dtype)
        l_sc[...] = jnp.zeros(l_sc.shape, dtype=l_sc.dtype)
        acc_sc[...] = jnp.zeros(acc_sc.shape, dtype=acc_sc.dtype)

    # scores = (Q / sqrt(E)) @ K^T : plain NN matmul against the pre-transposed K block,
    # lane-dense [tq, tk] f32 result, no in-kernel transpose.
    s = jnp.dot(q_ref[...], kt_ref[...], preferred_element_type=jnp.float32)

    # Flash-style online softmax update (all f32).
    m_new = jnp.maximum(m_sc[...], jnp.max(s, axis=-1, keepdims=True))
    alpha = jnp.exp(m_sc[...] - m_new)
    p = jnp.exp(s - m_new)
    l_sc[...] = alpha * l_sc[...] + jnp.sum(p, axis=-1, keepdims=True)
    acc_sc[...] = alpha * acc_sc[...] + jnp.dot(p.astype(v_ref.dtype), v_ref[...],
                                                preferred_element_type=jnp.float32)
    m_sc[...] = m_new

    @pl.when(kb == pl.num_programs(1) - 1)
    def _finalize():
        # Normalize, project out, skip connection (original f32 x rows), feed-forward.
        attn = acc_sc[...] * pl.reciprocal(l_sc[...], approx=True)          # [tq, Ep] f32
        attn = jnp.dot(attn.astype(wo_ref.dtype), wo_ref[...],
                       preferred_element_type=jnp.float32) + bo_ref[...]
        h = attn + xs_ref[...]                                               # SkipConnection
        ff = jnp.dot(h.astype(w1_ref.dtype), w1_ref[...],
                     preferred_element_type=jnp.float32) + b1_ref[...]
        ff = jnp.maximum(ff, 0.0)                                            # ReLU
        out = jnp.dot(ff.astype(w2_ref.dtype), w2_ref[...],
                      preferred_element_type=jnp.float32) + b2_ref[...]
        out_ref[...] = out.astype(out_ref.dtype)


def gat_forward(x, params, *, tq=None, tk=None,
                compute_dtype=jnp.bfloat16, out_dtype=jnp.float32):
    """x: [N, D] f32. params: dict of [in, out] weights and (1, out) biases (f32)."""
    N, D = x.shape
    E = params["wq"].shape[1]
    H = params["w1"].shape[1]

    Dp = _round_up(D, LANE)
    Ep = _round_up(E, LANE)
    Hp = _round_up(H, LANE)

    d_tq, d_tk = _pick_tiles(N)
    tq = d_tq if tq is None else tq
    tk = d_tk if tk is None else tk
    assert N % tq == 0 and N % tk == 0, "node count must be divisible by the row tiles"
    assert tq == N or tq % SUBLANE_BF16 == 0, "tq must be a multiple of 16 (bf16 packing)"
    assert tk == N or tk % LANE == 0, "tk is the lane dim of the Kt blocks -> multiple of 128"
    # TODO(synk): support N not divisible by the tiles by padding node rows and masking the
    #             padded key columns to -inf before the online softmax.

    inv_scale = 1.0 / math.sqrt(float(E))   # scale uses the *unpadded* embed dim

    # Q/K/V projections hoisted out of the grid (computed once, f32, then cast to bf16).
    # 1/sqrt(E) folded into Q; K stored transposed for in-kernel NN matmul scores.
    q = (x @ params["wq"]) * inv_scale
    k = x @ params["wk"]
    v = x @ params["wv"]
    qp = _pad2(q, N, Ep).astype(compute_dtype)        # [N, Ep]
    ktp = _pad2(k.T, Ep, N).astype(compute_dtype)     # [Ep, N]
    vp = _pad2(v, N, Ep).astype(compute_dtype)        # [N, Ep]
    xs = _pad2(x, N, Dp)                              # [N, Dp] f32 (skip connection)

    wo = _pad2(params["wo"], Ep, Dp).astype(compute_dtype)
    bo = _pad2(params["bo"], 1, Dp)
    w1 = _pad2(params["w1"], Dp, Hp).astype(compute_dtype)
    b1 = _pad2(params["b1"], 1, Hp)
    w2 = _pad2(params["w2"], Hp, Dp).astype(compute_dtype)
    b2 = _pad2(params["b2"], 1, Dp)

    rep = lambda i, j: (0, 0)   # replicated (constant) blocks

    def const_spec(shape):
        # Constant blocks never change across the grid -> single-buffer them.
        try:
            return pl.BlockSpec(shape, rep, pipeline_mode=pl.Buffered(1))
        except TypeError:       # very old jax without pipeline_mode
            return pl.BlockSpec(shape, rep)

    # Explicit VMEM budget (streamed blocks double-buffered, constants single-buffered).
    cdt = jnp.dtype(compute_dtype).itemsize
    odt = jnp.dtype(out_dtype).itemsize
    stream_bytes = 2 * (tq * Ep * cdt + Ep * tk * cdt + tk * Ep * cdt
                        + tq * Dp * 4 + tq * Dp * odt)
    const_bytes = (Ep * Dp + Dp * Hp + Hp * Dp) * cdt + (2 * Dp + Hp) * 4
    scratch_bytes = tq * Ep * 4 + 2 * tq * 4
    vmem_limit = max(2 * (stream_bytes + const_bytes + scratch_bytes), 16 << 20)
    vmem_limit = int(min(vmem_limit, 64 << 20))

    out = pl.pallas_call(
        _gat_kernel,
        out_shape=jax.ShapeDtypeStruct((N, Dp), out_dtype),
        grid_spec=pltpu.PrefetchScalarGridSpec(
            num_scalar_prefetch=0,
            grid=(N // tq, N // tk),
            in_specs=[
                pl.BlockSpec((tq, Ep), lambda i, j: (i, 0)),   # Q (pre-scaled, bf16)
                pl.BlockSpec((Ep, tk), lambda i, j: (0, j)),   # K^T (bf16)
                pl.BlockSpec((tk, Ep), lambda i, j: (j, 0)),   # V (bf16)
                pl.BlockSpec((tq, Dp), lambda i, j: (i, 0)),   # x rows (f32, skip connection)
                const_spec((Ep, Dp)),                          # Wo
                const_spec((1, Dp)),                           # bo
                const_spec((Dp, Hp)),                          # W1
                const_spec((1, Hp)),                           # b1
                const_spec((Hp, Dp)),                          # W2
                const_spec((1, Dp)),                           # b2
            ],
            out_specs=pl.BlockSpec((tq, Dp), lambda i, j: (i, 0)),
            scratch_shapes=[
                pltpu.VMEM((tq, 1), jnp.float32),      # running max
                pltpu.VMEM((tq, 1), jnp.float32),      # running denominator
                pltpu.VMEM((tq, Ep), jnp.float32),     # attention accumulator
            ]),
        compiler_params=pltpu.CompilerParams(
            dimension_semantics=("parallel", "arbitrary"),
            vmem_limit_bytes=vmem_limit),
    )(qp, ktp, vp, xs, wo, bo, w1, b1, w2, b2)

    return out if D == Dp else out[:, :D]


def init_params(key, input_dim, embed_dim, feed_forward_hidden):
    """PyTorch-style uniform(-1/sqrt(fan_in), 1/sqrt(fan_in)) init; weights stored as
    [in_features, out_features] (already transposed for x @ W)."""
    ks = jax.random.split(key, 8)

    def lin_w(k, fan_in, fan_out):
        bound = 1.0 / math.sqrt(fan_in)
        return jax.random.uniform(k, (fan_in, fan_out), jnp.float32, -bound, bound)

    def lin_b(k, fan_in, fan_out):
        bound = 1.0 / math.sqrt(fan_in)
        return jax.random.uniform(k, (1, fan_out), jnp.float32, -bound, bound)

    return {
        "wq": lin_w(ks[0], input_dim, embed_dim),
        "wk": lin_w(ks[1], input_dim, embed_dim),
        "wv": lin_w(ks[2], input_dim, embed_dim),
        "wo": lin_w(ks[3], embed_dim, input_dim),
        "bo": lin_b(ks[4], embed_dim, input_dim),
        "w1": lin_w(ks[5], input_dim, feed_forward_hidden),
        "b1": lin_b(ks[6], input_dim, feed_forward_hidden),
        "w2": lin_w(ks[7], feed_forward_hidden, input_dim),
        "b2": lin_b(key, feed_forward_hidden, input_dim),
    }


def gat_reference(x, p):
    """Pure-JAX f32 reference mirroring the PyTorch forward."""
    q, k, v = x @ p["wq"], x @ p["wk"], x @ p["wv"]
    scores = (q @ k.T) / math.sqrt(q.shape[-1])
    scores = jax.nn.softmax(scores, axis=-1)
    attn = scores @ v @ p["wo"] + p["bo"]
    h = attn + x
    ff = jnp.maximum(h @ p["w1"] + p["b1"], 0.0)
    return ff @ p["w2"] + p["b2"]


if __name__ == "__main__":
    num_nodes = 256          # smallest size that lets both grid axes be exercised with
    input_dim = 32           # 128-lane-aligned key tiles (tk must be a multiple of 128)
    embed_dim = 32
    feed_forward_hidden = 128

    key = jax.random.PRNGKey(0)
    k_x, k_p = jax.random.split(key)
    x = jax.random.normal(k_x, (num_nodes, input_dim), dtype=jnp.float32)
    params = init_params(k_p, input_dim, embed_dim, feed_forward_hidden)

    # tq=tk=128 -> 2 query tiles ("parallel") x 2 key blocks ("arbitrary" online-softmax
    # reduction); the defaults pick tq<=256 / tk<=512 for real node counts.
    out = gat_forward(x, params, tq=128, tk=128)
    out = jax.block_until_ready(out)

    ref = gat_reference(x, params)
    assert out.shape == (num_nodes, input_dim)
    max_err = float(jnp.max(jnp.abs(out - ref)))
    assert jnp.allclose(out, ref, atol=5e-2, rtol=5e-2), (
        f"mismatch vs. reference (max abs err = {max_err})")

    print("KERNEL_OK")
</pallas_src>

<mosaic_0001>
module attributes {stable_mosaic.version = 11 : i64} {
  func.func @_gat_kernel(%arg0: i32, %arg1: i32, %arg2: memref<128x128xbf16, #tpu.memory_space<vmem>>, %arg3: memref<128x128xbf16, #tpu.memory_space<vmem>>, %arg4: memref<128x128xbf16, #tpu.memory_space<vmem>>, %arg5: memref<128x128xf32, #tpu.memory_space<vmem>>, %arg6: memref<128x128xbf16, #tpu.memory_space<vmem>>, %arg7: memref<1x128xf32, #tpu.memory_space<vmem>>, %arg8: memref<128x128xbf16, #tpu.memory_space<vmem>>, %arg9: memref<1x128xf32, #tpu.memory_space<vmem>>, %arg10: memref<128x128xbf16, #tpu.memory_space<vmem>>, %arg11: memref<1x128xf32, #tpu.memory_space<vmem>>, %arg12: memref<128x128xf32, #tpu.memory_space<vmem>>, %arg13: memref<128x1xf32, #tpu.memory_space<vmem>>, %arg14: memref<128x1xf32, #tpu.memory_space<vmem>>, %arg15: memref<128x128xf32, #tpu.memory_space<vmem>>) attributes {dimension_semantics = [#tpu.dimension_semantics<parallel>, #tpu.dimension_semantics<arbitrary>], iteration_bounds = array<i64: 2, 2>, scalar_prefetch = 0 : i64, scratch_operands = 3 : i64, tpu.core_type = #tpu.core_type<tc>, window_params = [{transform_indices = @transform_0, window_bounds = array<i64: 128, 128>}, {transform_indices = @transform_1, window_bounds = array<i64: 128, 128>}, {transform_indices = @transform_2, window_bounds = array<i64: 128, 128>}, {transform_indices = @transform_3, window_bounds = array<i64: 128, 128>}, {pipeline_mode = #tpu.pipeline_mode<synchronous>, transform_indices = @transform_4, window_bounds = array<i64: 128, 128>}, {pipeline_mode = #tpu.pipeline_mode<synchronous>, transform_indices = @transform_5, window_bounds = array<i64: 1, 128>}, {pipeline_mode = #tpu.pipeline_mode<synchronous>, transform_indices = @transform_6, window_bounds = array<i64: 128, 128>}, {pipeline_mode = #tpu.pipeline_mode<synchronous>, transform_indices = @transform_7, window_bounds = array<i64: 1, 128>}, {pipeline_mode = #tpu.pipeline_mode<synchronous>, transform_indices = @transform_8, window_bounds = array<i64: 128, 128>}, {pipeline_mode = #tpu.pipeline_mode<synchronous>, transform_indices = @transform_9, window_bounds = array<i64: 1, 128>}, {transform_indices = @transform_10, window_bounds = array<i64: 128, 128>}]} {
    %c0_i32 = arith.constant 0 : i32
    %0 = arith.cmpi eq, %arg1, %c0_i32 : i32
    %1 = arith.extui %0 : i1 to i32
    %c0_i32_0 = arith.constant 0 : i32
    %2 = arith.cmpi ne, %1, %c0_i32_0 : i32
    scf.if %2 {
      %cst_24 = arith.constant 0xFF800000 : f32
      %34 = vector.broadcast %cst_24 : f32 to vector<128x1xf32>
      %c0_25 = arith.constant 0 : index
      %c0_26 = arith.constant 0 : index
      %35 = vector.load %arg13[%c0_25, %c0_26] : memref<128x1xf32, #tpu.memory_space<vmem>>, vector<128x1xf32>
      tpu.vector_store %arg13[%c0_25, %c0_26], %34 {strides = array<i32>} : memref<128x1xf32, #tpu.memory_space<vmem>>, vector<128x1xf32>,
      %cst_27 = arith.constant 0.000000e+00 : f32
      %36 = vector.broadcast %cst_27 : f32 to vector<128x1xf32>
      %c0_28 = arith.constant 0 : index
      %c0_29 = arith.constant 0 : index
      %37 = vector.load %arg14[%c0_28, %c0_29] : memref<128x1xf32, #tpu.memory_space<vmem>>, vector<128x1xf32>
      tpu.vector_store %arg14[%c0_28, %c0_29], %36 {strides = array<i32>} : memref<128x1xf32, #tpu.memory_space<vmem>>, vector<128x1xf32>,
      %cst_30 = arith.constant 0.000000e+00 : f32
      %38 = vector.broadcast %cst_30 : f32 to vector<128x128xf32>
      %c0_31 = arith.constant 0 : index
      %c0_32 = arith.constant 0 : index
      %39 = vector.load %arg15[%c0_31, %c0_32] : memref<128x128xf32, #tpu.memory_space<vmem>>, vector<128x128xf32>
      tpu.vector_store %arg15[%c0_31, %c0_32], %38 {strides = array<i32>} : memref<128x128xf32, #tpu.memory_space<vmem>>, vector<128x128xf32>,
    } else {
    }
    %c0 = arith.constant 0 : index
    %c0_1 = arith.constant 0 : index
    %3 = vector.load %arg2[%c0, %c0_1] : memref<128x128xbf16, #tpu.memory_space<vmem>>, vector<128x128xbf16>
    %c0_2 = arith.constant 0 : index
    %c0_3 = arith.constant 0 : index
    %4 = vector.load %arg3[%c0_2, %c0_3] : memref<128x128xbf16, #tpu.memory_space<vmem>>, vector<128x128xbf16>
    %cst = arith.constant dense<0.000000e+00> : vector<128x128xf32>
    %5 = tpu.matmul %3, %4, %cst {dimension_numbers = #tpu.dot_dimension_numbers<[1], [0], [0], [1], [0, 0, 1, 1], [], []>} : vector<128x128xbf16>, vector<128x128xbf16>, vector<128x128xf32> -> vector<128x128xf32>
    %c0_4 = arith.constant 0 : index
    %c0_5 = arith.constant 0 : index
    %6 = vector.load %arg13[%c0_4, %c0_5] : memref<128x1xf32, #tpu.memory_space<vmem>>, vector<128x1xf32>
    %cst_6 = arith.constant dense<0xFF800000> : vector<128xf32>
    %7 = vector.multi_reduction <maximumf>, %5, %cst_6 [1] : vector<128x128xf32> to vector<128xf32>
    %8 = vector.shape_cast %7 : vector<128xf32> to vector<128x1xf32>
    %9 = arith.maximumf %6, %8 : vector<128x1xf32>
    %c0_7 = arith.constant 0 : index
    %c0_8 = arith.constant 0 : index
    %10 = vector.load %arg13[%c0_7, %c0_8] : memref<128x1xf32, #tpu.memory_space<vmem>>, vector<128x1xf32>
    %11 = arith.subf %10, %9 : vector<128x1xf32>
    %12 = math.exp %11 : vector<128x1xf32>
    %13 = vector.broadcast %9 : vector<128x1xf32> to vector<128x128xf32>
    %14 = arith.subf %5, %13 : vector<128x128xf32>
    %15 = math.exp %14 : vector<128x128xf32>
    %c0_9 = arith.constant 0 : index
    %c0_10 = arith.constant 0 : index
    %16 = vector.load %arg14[%c0_9, %c0_10] : memref<128x1xf32, #tpu.memory_space<vmem>>, vector<128x1xf32>
    %17 = arith.mulf %12, %16 : vector<128x1xf32>
    %cst_11 = arith.constant dense<0.000000e+00> : vector<128xf32>
    %18 = vector.multi_reduction <add>, %15, %cst_11 [1] : vector<128x128xf32> to vector<128xf32>
    %19 = vector.shape_cast %18 : vector<128xf32> to vector<128x1xf32>
    %20 = arith.addf %17, %19 : vector<128x1xf32>
    %c0_12 = arith.constant 0 : index
    %c0_13 = arith.constant 0 : index
    %21 = vector.load %arg14[%c0_12, %c0_13] : memref<128x1xf32, #tpu.memory_space<vmem>>, vector<128x1xf32>
    tpu.vector_store %arg14[%c0_12, %c0_13], %20 {strides = array<i32>} : memref<128x1xf32, #tpu.memory_space<vmem>>, vector<128x1xf32>,
    %c0_14 = arith.constant 0 : index
    %c0_15 = arith.constant 0 : index
    %22 = vector.load %arg15[%c0_14, %c0_15] : memref<128x128xf32, #tpu.memory_space<vmem>>, vector<128x128xf32>
    %23 = vector.broadcast %12 : vector<128x1xf32> to vector<128x128xf32>
    %24 = arith.mulf %23, %22 : vector<128x128xf32>
    %25 = arith.truncf %15 : vector<128x128xf32> to vector<128x128xbf16>
    %c0_16 = arith.constant 0 : index
    %c0_17 = arith.constant 0 : index
    %26 = vector.load %arg4[%c0_16, %c0_17] : memref<128x128xbf16, #tpu.memory_space<vmem>>, vector<128x128xbf16>
    %cst_18 = arith.constant dense<0.000000e+00> : vector<128x128xf32>
    %27 = tpu.matmul %25, %26, %cst_18 {dimension_numbers = #tpu.dot_dimension_numbers<[1], [0], [0], [1], [0, 0, 1, 1], [], []>} : vector<128x128xbf16>, vector<128x128xbf16>, vector<128x128xf32> -> vector<128x128xf32>
    %28 = arith.addf %24, %27 : vector<128x128xf32>
    %c0_19 = arith.constant 0 : index
    %c0_20 = arith.constant 0 : index
    %29 = vector.load %arg15[%c0_19, %c0_20] : memref<128x128xf32, #tpu.memory_space<vmem>>, vector<128x128xf32>
    tpu.vector_store %arg15[%c0_19, %c0_20], %28 {strides = array<i32>} : memref<128x128xf32, #tpu.memory_space<vmem>>, vector<128x128xf32>,
    %c0_21 = arith.constant 0 : index
    %c0_22 = arith.constant 0 : index
    %30 = vector.load %arg13[%c0_21, %c0_22] : memref<128x1xf32, #tpu.memory_space<vmem>>, vector<128x1xf32>
    tpu.vector_store %arg13[%c0_21, %c0_22], %9 {strides = array<i32>} : memref<128x1xf32, #tpu.memory_space<vmem>>, vector<128x1xf32>,
    %c1_i32 = arith.constant 1 : i32
    %31 = arith.cmpi eq, %arg1, %c1_i32 : i32
    %32 = arith.extui %31 : i1 to i32
    %c0_i32_23 = arith.constant 0 : i32
    %33 = arith.cmpi ne, %32, %c0_i32_23 : i32
    scf.if %33 {
      %c0_24 = arith.constant 0 : index
      %c0_25 = arith.constant 0 : index
      %34 = vector.load %arg15[%c0_24, %c0_25] : memref<128x128xf32, #tpu.memory_space<vmem>>, vector<128x128xf32>
      %c0_26 = arith.constant 0 : index
      %c0_27 = arith.constant 0 : index
      %35 = vector.load %arg14[%c0_26, %c0_27] : memref<128x1xf32, #tpu.memory_space<vmem>>, vector<128x1xf32>
      %36 = tpu.reciprocal %35 {approx = true} : vector<128x1xf32> -> vector<128x1xf32>
      %37 = vector.broadcast %36 : vector<128x1xf32> to vector<128x128xf32>
      %38 = arith.mulf %34, %37 : vector<128x128xf32>
      %39 = arith.truncf %38 : vector<128x128xf32> to vector<128x128xbf16>
      %c0_28 = arith.constant 0 : index
      %c0_29 = arith.constant 0 : index
      %40 = vector.load %arg6[%c0_28, %c0_29] : memref<128x128xbf16, #tpu.memory_space<vmem>>, vector<128x128xbf16>
      %cst_30 = arith.constant dense<0.000000e+00> : vector<128x128xf32>
      %41 = tpu.matmul %39, %40, %cst_30 {dimension_numbers = #tpu.dot_dimension_numbers<[1], [0], [0], [1], [0, 0, 1, 1], [], []>} : vector<128x128xbf16>, vector<128x128xbf16>, vector<128x128xf32> -> vector<128x128xf32>
      %c0_31 = arith.constant 0 : index
      %c0_32 = arith.constant 0 : index
      %42 = vector.load %arg7[%c0_31, %c0_32] : memref<1x128xf32, #tpu.memory_space<vmem>>, vector<1x128xf32>
      %43 = vector.broadcast %42 : vector<1x128xf32> to vector<128x128xf32>
      %44 = arith.addf %41, %43 : vector<128x128xf32>
      %c0_33 = arith.constant 0 : index
      %c0_34 = arith.constant 0 : index
      %45 = vector.load %arg5[%c0_33, %c0_34] : memref<128x128xf32, #tpu.memory_space<vmem>>, vector<128x128xf32>
      %46 = arith.addf %44, %45 : vector<128x128xf32>
      %47 = arith.truncf %46 : vector<128x128xf32> to vector<128x128xbf16>
      %c0_35 = arith.constant 0 : index
      %c0_36 = arith.constant 0 : index
      %48 = vector.load %arg8[%c0_35, %c0_36] : memref<128x128xbf16, #tpu.memory_space<vmem>>, vector<128x128xbf16>
      %cst_37 = arith.constant dense<0.000000e+00> : vector<128x128xf32>
      %49 = tpu.matmul %47, %48, %cst_37 {dimension_numbers = #tpu.dot_dimension_numbers<[1], [0], [0], [1], [0, 0, 1, 1], [], []>} : vector<128x128xbf16>, vector<128x128xbf16>, vector<128x128xf32> -> vector<128x128xf32>
      %c0_38 = arith.constant 0 : index
      %c0_39 = arith.constant 0 : index
      %50 = vector.load %arg9[%c0_38, %c0_39] : memref<1x128xf32, #tpu.memory_space<vmem>>, vector<1x128xf32>
      %51 = vector.broadcast %50 : vector<1x128xf32> to vector<128x128xf32>
      %52 = arith.addf %49, %51 : vector<128x128xf32>
      %cst_40 = arith.constant 0.000000e+00 : f32
      %53 = vector.broadcast %cst_40 : f32 to vector<128x128xf32>
      %54 = arith.maximumf %52, %53 : vector<128x128xf32>
      %55 = arith.truncf %54 : vector<128x128xf32> to vector<128x128xbf16>
      %c0_41 = arith.constant 0 : index
      %c0_42 = arith.constant 0 : index
      %56 = vector.load %arg10[%c0_41, %c0_42] : memref<128x128xbf16, #tpu.memory_space<vmem>>, vector<128x128xbf16>
      %cst_43 = arith.constant dense<0.000000e+00> : vector<128x128xf32>
      %57 = tpu.matmul %55, %56, %cst_43 {dimension_numbers = #tpu.dot_dimension_numbers<[1], [0], [0], [1], [0, 0, 1, 1], [], []>} : vector<128x128xbf16>, vector<128x128xbf16>, vector<128x128xf32> -> vector<128x128xf32>
      %c0_44 = arith.constant 0 : index
      %c0_45 = arith.constant 0 : index
      %58 = vector.load %arg11[%c0_44, %c0_45] : memref<1x128xf32, #tpu.memory_space<vmem>>, vector<1x128xf32>
      %59 = vector.broadcast %58 : vector<1x128xf32> to vector<128x128xf32>
      %60 = arith.addf %57, %59 : vector<128x128xf32>
      %c0_46 = arith.constant 0 : index
      %c0_47 = arith.constant 0 : index
      %61 = vector.load %arg12[%c0_46, %c0_47] : memref<128x128xf32, #tpu.memory_space<vmem>>, vector<128x128xf32>
      tpu.vector_store %arg12[%c0_46, %c0_47], %60 {strides = array<i32>} : memref<128x128xf32, #tpu.memory_space<vmem>>, vector<128x128xf32>,
    } else {
    }
    return
  }
  func.func @transform_0(%arg0: i32, %arg1: i32) -> (i32, i32) {
    %c0_i32 = arith.constant 0 : i32
    %c0_i32_0 = arith.constant 0 : i32
    return %arg0, %c0_i32 : i32, i32
  }
  func.func @transform_1(%arg0: i32, %arg1: i32) -> (i32, i32) {
    %c0_i32 = arith.constant 0 : i32
    %c0_i32_0 = arith.constant 0 : i32
    return %c0_i32, %arg1 : i32, i32
  }
  func.func @transform_2(%arg0: i32, %arg1: i32) -> (i32, i32) {
    %c0_i32 = arith.constant 0 : i32
    %c0_i32_0 = arith.constant 0 : i32
    return %arg1, %c0_i32 : i32, i32
  }
  func.func @transform_3(%arg0: i32, %arg1: i32) -> (i32, i32) {
    %c0_i32 = arith.constant 0 : i32
    %c0_i32_0 = arith.constant 0 : i32
    return %arg0, %c0_i32 : i32, i32
  }
  func.func @transform_4(%arg0: i32, %arg1: i32) -> (i32, i32) {
    %c0_i32 = arith.constant 0 : i32
    %c0_i32_0 = arith.constant 0 : i32
    %c0_i32_1 = arith.constant 0 : i32
    return %c0_i32, %c0_i32_0 : i32, i32
  }
  func.func @transform_5(%arg0: i32, %arg1: i32) -> (i32, i32) {
    %c0_i32 = arith.constant 0 : i32
    %c0_i32_0 = arith.constant 0 : i32
    %c0_i32_1 = arith.constant 0 : i32
    return %c0_i32, %c0_i32_0 : i32, i32
  }
  func.func @transform_6(%arg0: i32, %arg1: i32) -> (i32, i32) {
    %c0_i32 = arith.constant 0 : i32
    %c0_i32_0 = arith.constant 0 : i32
    %c0_i32_1 = arith.constant 0 : i32
    return %c0_i32, %c0_i32_0 : i32, i32
  }
  func.func @transform_7(%arg0: i32, %arg1: i32) -> (i32, i32) {
    %c0_i32 = arith.constant 0 : i32
    %c0_i32_0 = arith.constant 0 : i32
    %c0_i32_1 = arith.constant 0 : i32
    return %c0_i32, %c0_i32_0 : i32, i32
  }
  func.func @transform_8(%arg0: i32, %arg1: i32) -> (i32, i32) {
    %c0_i32 = arith.constant 0 : i32
    %c0_i32_0 = arith.constant 0 : i32
    %c0_i32_1 = arith.constant 0 : i32
    return %c0_i32, %c0_i32_0 : i32, i32
  }
  func.func @transform_9(%arg0: i32, %arg1: i32) -> (i32, i32) {
    %c0_i32 = arith.constant 0 : i32
    %c0_i32_0 = arith.constant 0 : i32
    %c0_i32_1 = arith.constant 0 : i32
    return %c0_i32, %c0_i32_0 : i32, i32
  }
  func.func @transform_10(%arg0: i32, %arg1: i32) -> (i32, i32) {
    %c0_i32 = arith.constant 0 : i32
    %c0_i32_0 = arith.constant 0 : i32
    return %arg0, %c0_i32 : i32, i32
  }
}

</mosaic_0001>

<bundles_post_ra>
// kernel: tpu_custom_call.1
= control target key start
LH: loop header
LB: loop body
LE: loop exit
PB: predicated region body
PF: predicated region fallthrough
CT: control target
= control target key end

     0   :  { %s4479_s0 = inlined_call_operand.hbm [shape: bf16[256,128], index: 0, kind: input, shape index: {}]   ;;  %s4480_s1 = inlined_call_operand.hbm [shape: bf16[128,256], index: 1, kind: input, shape index: {}]   ;;  %s4481_s2 = inlined_call_operand.hbm [shape: bf16[256,128], index: 2, kind: input, shape index: {}]   ;;  %s4482_s3 = inlined_call_operand.hbm [shape: f32[256,128], index: 3, kind: input, shape index: {}]   ;;  %s4483_s4 = inlined_call_operand.hbm [shape: bf16[128,128], index: 4, kind: input, shape index: {}]   ;;  %s4484_s5 = inlined_call_operand.vmem [shape: f32[1,128], index: 5, kind: input, shape index: {}]   ;;  %s4485_s6 = inlined_call_operand.hbm [shape: bf16[128,128], index: 6, kind: input, shape index: {}]   ;;  %s4486_s7 = inlined_call_operand.vmem [shape: f32[1,128], index: 7, kind: input, shape index: {}]   ;;  %s4487_s8 = inlined_call_operand.hbm [shape: bf16[128,128], index: 8, kind: input, shape index: {}]   ;;  %s4488_s9 = inlined_call_operand.vmem [shape: f32[1,128], index: 9, kind: input, shape index: {}]   ;;  %s4489_s10 = inlined_call_operand.hbm [shape: f32[256,128], index: 10, kind: output, shape index: {}]  }
   0x1   :  { %4516 = sst [smem:[#allocation34_spill]] %s4480_s1 }
   0x2   :  { %4517 = sst [smem:[#allocation35_spill]] %s4483_s4 }
   0x3   :  { %4518 = sst [smem:[#allocation36_spill]] %s4484_s5 }
   0x4   :  { %4519 = sst [smem:[#allocation37_spill]] %s4485_s6 }
   0x5   :  { %4520 = sst [smem:[#allocation38_spill]] %s4486_s7 }
   0x6   :  { %4521 = sst [smem:[#allocation39_spill]] %s4488_s9 }
   0x7   :  { %4522 = sst [smem:[#allocation40_spill]] %s4489_s10 }
   0x8   :  { %15 = vsyncpa [#allocation6], 0 }
   0x9   :  { %17 = vsyncpa [#allocation6 + $0x1], 0 }
   0xa   :  { %18 = vsyncpa [#allocation9], 0 }
   0xb   :  { %20 = vsyncpa [#allocation9 + $0x1], 0 }
   0xc   :  { %21 = vsyncpa [#allocation12], 0 }
   0xd   :  { %23 = vsyncpa [#allocation12 + $0x1], 0 }
   0xe   :  { %24 = vsyncpa [#allocation15], 0 }
   0xf   :  { %25 = vsyncpa [#allocation7], 0 }
  0x10   :  { %27 = vsyncpa [#allocation7 + $0x1], 0  ;;  %s3498_s13 = smov 0   ;;  %s3500_s14 = smov 0  }
  0x11   :  { %s3502_s15 = smov 0   ;;  %s3504_s16 = smov 0  }
  0x12   :  { %s3506_s17 = smov 0   ;;  %s3508_s18 = smov 0  }
  0x13   :  { %s3510_s19 = smov 0   ;;  %s3512_s20 = smov 0  }
  0x14   :  { %s3514_s21 = smov 0   ;;  %s3516_s22 = smov 0  }
  0x15   :  { %s3518_s23 = smov 0  }
  0x16 LB: > { %4523 = sst [smem:[#allocation24_spill]] %s3387_s14  ;;  %s3552_s24 = sadd.s32 4294967295, %s3423_s23   ;;  %s3423_s23 = sphi %s3518_s23, %s33_s23   ;;  %s3419_s22 = sphi %s3516_s22, %s4595_s22   ;;  %s3415_s21 = sphi %s3514_s21, %s4594_s21   ;;  %s3411_s20 = sphi %s3512_s20, %s4593_s20   ;;  %s3407_s19 = sphi %s3510_s19, %s4592_s19   ;;  %s3403_s18 = sphi %s3508_s18, %s4591_s18   ;;  %s3399_s17 = sphi %s3506_s17, %s4590_s17   ;;  %s3395_s16 = sphi %s3504_s16, %s4589_s16   ;;  %s3391_s15 = sphi %s3502_s15, %s4588_s15   ;;  %s3387_s14 = sphi %s3500_s14, %s4587_s14   ;;  %s3383_s13 = sphi %s3498_s13, %s4581_s13  }
  0x17   : > { %4524 = sst [smem:[#allocation25_spill]] %s3391_s15  ;;  %s2431_s25 = sadd.s32 4294967294, %s3423_s23  }
  0x18   : > { %4525 = sst [smem:[#allocation26_spill]] %s3395_s16  ;;  %p65_p0 = scmp.ne.s32.totalorder %s3399_s17, %s3395_s16 }
  0x19   : > { %4526 = sst [smem:[#allocation27_spill]] %s3407_s19  ;;  %p4493_p1 = scmp.eq.s32.totalorder %s3552_s24, 0 }
  0x1a   : > { %4527 = sst [smem:[#allocation28_spill]] %s3411_s20  ;;  %p91_p2 = scmp.ne.s32.totalorder %s3387_s14, %s3383_s13 }
  0x1b   : > { %p3562_p4 = por %p4493_p1, %p65_p0  ;;  %p299_p5 = scmp.eq.s32.totalorder %s2431_s25, 3 }
  0x1c   : > { %p3568_p6 = por %p91_p2, %p4493_p1  ;;  %p2432_p7 = scmp.ge.s32.totalorder %s3423_s23, 1 }
  0x1d   : > { %s4528_s26 = scalar_select %p3562_p4, 1, 0 }
  0x1e   : > { %s4530_s27 = scalar_select %p3568_p6, 1, 0 }
  0x1f   : > { %4529 = sst [smem:[#allocation29_spill]] %s4528_s26  ;;  %p3573_p8 = por %p299_p5, %p65_p0 }
  0x20   : > { %4531 = sst [smem:[#allocation30_spill]] %s4530_s27  ;;  %p306_p9 = scmp.lt.s32.totalorder %s3423_s23, 5 }
  0x21   : > { %s4532_s28 = scalar_select %p3573_p8, 1, 0 }
  0x22   : > { %p3578_p10 = pnand %p2432_p7, %p306_p9  ;;  %s3425_s30 = smov [#allocation13]  }
  0x23   : > { %4533 = sst [smem:[#allocation31_spill]] %s4532_s28  ;;  %s318_s11 = sshll.u32 %s3425_s30, 4  ;;  %s319_s11 = int_to_ptr.vmem [resolvable:$true] %s318_s11 }
  0x24   : > { %s4534_s29 = scalar_select %p3578_p10, 1, 0 }
  0x25   : > { %p2797_p11 = pneg %p3578_p10  ;;  %s3426_s13 = smov [#allocation14]  }
  0x26   : > { %s334_s25 = sshll.u32 %s3426_s13, 4  ;;  %s4536_s4 = sld [smem:[#allocation35_spill]]  ;;  %s3590_s25 = int_to_ptr.vmem [resolvable:$true] %s334_s25 }
  0x27   : > { %p3586_p12 = pnand %p2797_p11, %p4493_p1 }
  0x29   : > { %s4535_s12 = scalar_select %p3586_p12, 1, 0 }
  0x2a   : > { %p3600_p0 = pneg %p3586_p12 }
  0x2c   : > { %s3081_s10 = scalar_lea.hbm %s4536_s4, 1024 }
  0x2d   : > { %p3082_p13 = scmp.ne.s32.totalorder %s4536_s4, %s3081_s10  ;;  %p3088_p7 = scmp.lt.u32.totalorder %s3081_s10, %s4536_s4 }
  0x2f   : > { %p3084_p2 = pnand %p3600_p0, %p3082_p13 }
  0x31   : > { %p3085_p5 = pneg %p3084_p2 }
  0x33   : > { %p3090_p9 = pnand %p3088_p7, %p3085_p5 }
  0x35   : > { %3093 = shalt.err (!%p3090_p9)
}
  0x36   : > { %s3094_s16 = scalar_lea.vmem %s319_s11, 1024  ;;  %p3102_p8 = scmp.lt.s32.totalorder %s319_s11, %s319_s11 }
  0x37   : > { %p3095_p11 = scmp.ne.s32.totalorder %s319_s11, %s3094_s16  ;;  %p3103_p6 = scmp.lt.s32.totalorder %s3094_s16, %s3094_s16 }
  0x39   : > { %p3097_p1 = pnand %p3095_p11, %p3600_p0  ;;  %p3104_p4 = por %p3103_p6, %p3102_p8 }
  0x3b   : > { %p3098_p3 = pneg %p3097_p1 }
  0x3d   : > { %p3105_p10 = pnand %p3104_p4, %p3098_p3 }
  0x3f   : > { %3108 = shalt.err (!%p3105_p10)
}
  0x40   : > { %s4501_s9 = smov 64   ;;  %s4503_s20 = smov 4  }
  0x41   : > { %2800 = dma.hbm_to_vmem [thread:$0]  (!%p3586_p12), %s4536_s4, 1024, %s319_s11, [#allocation12], %s4501_s9, %s4501_s9, %s4503_s20  }
  0x42   : > { %s4538_s6 = sld [smem:[#allocation37_spill]] }
  0x48   : > { %s3109_s5 = scalar_lea.hbm %s4538_s6, 1024 }
  0x49   : > { %p3110_p1 = scmp.ne.s32.totalorder %s4538_s6, %s3109_s5  ;;  %p3116_p6 = scmp.lt.u32.totalorder %s3109_s5, %s4538_s6 }
  0x4b   : > { %p3112_p3 = pnand %p3110_p1, %p3600_p0 }
  0x4d   : > { %p3113_p4 = pneg %p3112_p3 }
  0x4f   : > { %p3118_p8 = pnand %p3116_p6, %p3113_p4 }
  0x51   : > { %3121 = shalt.err (!%p3118_p8)
}
  0x52   : > { %s3122_s11 = scalar_lea.vmem %s3590_s25, 1024  ;;  %p3130_p5 = scmp.lt.s32.totalorder %s3590_s25, %s3590_s25 }
  0x53   : > { %p3123_p10 = scmp.ne.s32.totalorder %s3590_s25, %s3122_s11  ;;  %p3131_p7 = scmp.lt.s32.totalorder %s3122_s11, %s3122_s11 }
  0x55   : > { %p3125_p13 = pnand %p3123_p10, %p3600_p0  ;;  %p3132_p9 = por %p3131_p7, %p3130_p5 }
  0x57   : > { %p3126_p2 = pneg %p3125_p13 }
  0x59   : > { %p3133_p11 = pnand %p3132_p9, %p3126_p2 }
  0x5b   : > { %3136 = shalt.err (!%p3133_p11)
}
  0x5c   : > { %2803 = dma.hbm_to_vmem [thread:$0]  (!%p3586_p12), %s4538_s6, 1024, %s3590_s25, [#allocation15], %s4501_s9, %s4501_s9, %s4503_s20  }
  0x5d   : > { %s42_s26 = sadd.s32 1, %s3415_s21  ;;  %p4506_p1 = scmp.eq.s32.totalorder %s3423_s23, 0 }
  0x5e   : > { %p3647_p3 = scmp.ge.s32.totalorder %s42_s26, 2  ;;  %s78_s7 = sadd.s32 1, %s3391_s15 }
  0x5f   : > { %p85_p4 = scmp.ne.s32.totalorder %s3391_s15, %s3387_s14  ;;  %p4505_p6 = scmp.lt.s32.totalorder %s3423_s23, 4 }
  0x60   : > { %s4539_s27 = scalar_select %p3647_p3, 1, 0 }
  0x61   : > { %s4597_s26 = smov (%p3647_p3, %s42_s26), 0  ;;  %p87_p8 = por %p85_p4, %p4506_p1 }
  0x62   : > { %4540 = sst [smem:[#allocation32_spill]] %s4597_s26  ;;  %s75_s25 = ssub.s32 %s3415_s21, %s4597_s26 }
  0x63   : > { %p76_p10 = scmp.eq.s32.totalorder %s75_s25, 0  ;;  %s390_s28 = sand.u32 1, %s3391_s15  }
  0x64   : > { %s3665_s13 = sshll.u32 %s390_s28, 6  ;;  %s2441_s16 = sshll.u32 %s3415_s21, 6 }
  0x65   : > { %s3669_s11 = scalar_select %p76_p10, %s3391_s15, %s78_s7  }
  0x66   : > { %s4542_s1 = sld [smem:[#allocation34_spill]]  ;;  %s392_s20 = scalar_lea.vmem [#allocation8], %s3665_s13 }
  0x67   : > { %4541 = sst [smem:[#allocation33_spill]] %s3669_s11  ;;  %s398_s10 = sshll.u32 %s392_s20, 4  ;;  %s3683_s10 = int_to_ptr.vmem [resolvable:$true] %s398_s10 }
  0x68   : > { %p3679_p13 = pnand %p4505_p6, %p87_p8  ;;  %s4544_s7 = sand.u32 1, %s3423_s23  }
  0x69   : > { %s3687_s28 = scalar_lea.sflag [#allocation9], %s4544_s7 }
  0x6a   : > { %p4512_p5 = pneg %p3679_p13 }
  0x6c   : > { %s3674_s9 = scalar_lea.hbm %s4542_s1, %s2441_s16  ;;  %s3142_s19 = scalar_lea.hbm %s4542_s1, 2048 }
  0x6d   : > { %s3137_s16 = scalar_lea.hbm %s3674_s9, 1024  ;;  %p3143_p11 = scmp.lt.u32.totalorder %s3674_s9, %s4542_s1 }
  0x6e   : > { %p3138_p2 = scmp.ne.s32.totalorder %s3674_s9, %s3137_s16  ;;  %p3144_p4 = scmp.lt.u32.totalorder %s3142_s19, %s3137_s16 }
  0x6f   : > { %p3146_p10 = scmp.lt.u32.totalorder %s3137_s16, %s3674_s9 }
  0x70   : > { %p3140_p7 = pnand %p4512_p5, %p3138_p2  ;;  %p3145_p8 = por %p3144_p4, %p3143_p11 }
  0x72   : > { %p3141_p9 = pneg %p3140_p7  ;;  %p3147_p6 = por %p3146_p10, %p3145_p8 }
  0x74   : > { %p3148_p1 = pnand %p3147_p6, %p3141_p9 }
  0x76   : > { %3151 = shalt.err (!%p3148_p1)
}
  0x77   : > { %s3152_s7 = scalar_lea.vmem %s3683_s10, 1024  ;;  %s3429_s20 = smov [#allocation8]  }
  0x78   : > { %p3153_p2 = scmp.ne.s32.totalorder %s3683_s10, %s3152_s7  ;;  %s3157_s5 = sshll.u32 %s3429_s20, 4  ;;  %s3158_s5 = int_to_ptr.vmem [resolvable:$false] %s3157_s5 }
  0x79   : > { %s3159_s4 = scalar_lea.vmem %s3158_s5, 2048  ;;  %p3160_p12 = scmp.lt.s32.totalorder %s3683_s10, %s3158_s5 }
  0x7a   : > { %p3155_p7 = pnand %p3153_p2, %p4512_p5  ;;  %p3161_p11 = scmp.lt.s32.totalorder %s3159_s4, %s3152_s7 }
  0x7c   : > { %p3156_p3 = pneg %p3155_p7  ;;  %p3162_p4 = por %p3161_p11, %p3160_p12 }
  0x7e   : > { %p3163_p8 = pnand %p3162_p4, %p3156_p3 }
  0x80   : > { %3166 = shalt.err (!%p3163_p8)
}
  0x81   : > { %s4513_s6 = smov 128   ;;  %s4545_s16 = smov 4  }
  0x82   : > { %s4546_s19 = smov 64   ;;  %s3431_s1 = smov [#allocation16]  }
  0x83   : > { %2813 = dma.hbm_to_vmem [thread:$0]  (!%p3679_p13), %s3674_s9, 1024, %s3683_s10, %s3687_s28, %s4513_s6, %s4546_s19, %s4545_s16  }
  0x84   : > { %s350_s20 = sshll.u32 %s3431_s1, 4  ;;  %s3167_s7 = scalar_lea.hbm %s4487_s8, 1024  ;;  %s351_s20 = int_to_ptr.vmem [resolvable:$true] %s350_s20 }
  0x85   : > { %p3168_p12 = scmp.ne.s32.totalorder %s4487_s8, %s3167_s7  ;;  %p3174_p6 = scmp.lt.u32.totalorder %s3167_s7, %s4487_s8 }
  0x87   : > { %p3170_p1 = pnand %p3168_p12, %p3600_p0 }
  0x89   : > { %p3171_p3 = pneg %p3170_p1 }
  0x8b   : > { %p3176_p9 = pnand %p3174_p6, %p3171_p3 }
  0x8d   : > { %3179 = shalt.err (!%p3176_p9)
}
  0x8e   : > { %s3180_s9 = scalar_lea.vmem %s351_s20, 1024  ;;  %p3188_p11 = scmp.lt.s32.totalorder %s351_s20, %s351_s20 }
  0x8f   : > { %p3181_p10 = scmp.ne.s32.totalorder %s351_s20, %s3180_s9  ;;  %p3189_p4 = scmp.lt.s32.totalorder %s3180_s9, %s3180_s9 }
  0x91   : > { %p3183_p2 = pnand %p3181_p10, %p3600_p0  ;;  %p3190_p8 = por %p3189_p4, %p3188_p11 }
  0x93   : > { %p3184_p7 = pneg %p3183_p2 }
  0x95   : > { %p3191_p5 = pnand %p3190_p8, %p3184_p7 }
  0x97   : > { %3194 = shalt.err (!%p3191_p5)
}
  0x98   : > { %p4547_p12 = scmp.ne.s32.totalorder %s4535_s12, 0  ;;  %s45_s15 = sadd.s32 1, %s3419_s22 }
  0x99   : > { %s52_s12 = sadd.s32 1, %s3403_s18  ;;  %p4548_p0 = scmp.ne.s32.totalorder %s4539_s27, 0 }
  0x9a   : > { %2806 = dma.hbm_to_vmem [thread:$0]  (!%p4547_p12), %s4487_s8, 1024, %s351_s20, [#allocation15], %s4546_s19, %s4546_s19, %s4545_s16  }
  0x9b   : > { %s4599_s15 = smov (!%p4548_p0, %s45_s15), %s3419_s22  ;;  %p59_p5 = scmp.ne.s32.totalorder %s3403_s18, %s3399_s17 }
  0x9c   : > { %s3747_s30 = sand.u32 1, %s3403_s18   ;;  %p47_p1 = scmp.ge.s32.totalorder %s4599_s15, 2 }
  0x9d   : > { %p4549_p3 = scmp.eq.s32.totalorder %s3423_s23, 0  ;;  %p4550_p9 = scmp.eq.s32.totalorder %s3552_s24, 3 }
  0x9e   : > { %s4601_s15 = smov (%p47_p1, %s4599_s15), 0  ;;  %s2437_s10 = sshll.u32 %s3747_s30, 6 }
  0x9f   : > { %p61_p6 = por %p4549_p3, %p59_p5  ;;  %p3753_p10 = por %p4550_p9, %p59_p5 }
  0xa0   : > { %s2515_s27 = sshll.u32 %s3419_s22, 10  ;;  %s49_s11 = ssub.s32 %s3419_s22, %s4601_s15 }
  0xa1   : > { %s4551_s26 = scalar_select %p3753_p10, 1, 0 }
  0xa2   : > { %p50_p2 = scmp.eq.s32.totalorder %s49_s11, 0  ;;  %s3766_s7 = scalar_lea.hbm %s4479_s0, %s2515_s27 }
  0xa3   : > { %s371_s4 = scalar_lea.vmem [#allocation5], %s2437_s10  ;;  %p4552_p7 = scmp.lt.s32.totalorder %s3423_s23, 4 }
  0xa4   : > { %s378_s9 = sshll.u32 %s371_s4, 4  ;;  %s368_s11 = scalar_lea.sflag [#allocation6], %s3747_s30  ;;  %s3777_s9 = int_to_ptr.vmem [resolvable:$true] %s378_s9 }
  0xa5   : > { %p3770_p11 = pnand %p4552_p7, %p61_p6  ;;  %s3195_s27 = scalar_lea.hbm %s3766_s7, 1024 }
  0xa6   : > { %s3775_s14 = scalar_select %p50_p2, %s3403_s18, %s52_s12  }
  0xa7   : > { %p3196_p4 = scmp.ne.s32.totalorder %s3766_s7, %s3195_s27  ;;  %p4515_p8 = pneg %p3770_p11 }
  0xa8   : > { %s3200_s5 = scalar_lea.hbm %s4479_s0, 2048  ;;  %p3201_p5 = scmp.lt.u32.totalorder %s3766_s7, %s4479_s0 }
  0xa9   : > { %p3198_p12 = pnand %p4515_p8, %p3196_p4  ;;  %p3202_p1 = scmp.lt.u32.totalorder %s3200_s5, %s3195_s27 }
  0xaa   : > { %p3204_p6 = scmp.lt.u32.totalorder %s3195_s27, %s3766_s7 }
  0xab   : > { %p3199_p0 = pneg %p3198_p12  ;;  %p3203_p3 = por %p3202_p1, %p3201_p5 }
  0xad   : > { %p3205_p9 = por %p3204_p6, %p3203_p3 }
  0xaf   : > { %p3206_p2 = pnand %p3205_p9, %p3199_p0 }
  0xb1   : > { %3209 = shalt.err (!%p3206_p2)
}
  0xb2   : > { %s3210_s12 = scalar_lea.vmem %s3777_s9, 1024  ;;  %s3432_s10 = smov [#allocation5]  }
  0xb3   : > { %p3211_p7 = scmp.ne.s32.totalorder %s3777_s9, %s3210_s12  ;;  %s3215_s20 = sshll.u32 %s3432_s10, 4  ;;  %s3216_s20 = int_to_ptr.vmem [resolvable:$false] %s3215_s20 }
  0xb4   : > { %s3217_s6 = scalar_lea.vmem %s3216_s20, 2048  ;;  %p3218_p10 = scmp.lt.s32.totalorder %s3777_s9, %s3216_s20 }
  0xb5   : > { %p3213_p4 = pnand %p3211_p7, %p4515_p8  ;;  %p3219_p5 = scmp.lt.s32.totalorder %s3217_s6, %s3210_s12 }
  0xb7   : > { %p3214_p12 = pneg %p3213_p4  ;;  %p3220_p1 = por %p3219_p5, %p3218_p10 }
  0xb9   : > { %p3221_p3 = pnand %p3220_p1, %p3214_p12 }
  0xbb   : > { %3224 = shalt.err (!%p3221_p3)
}
  0xbc   : > { %2810 = dma.hbm_to_vmem [thread:$0]  (!%p3770_p11), %s3766_s7, 1024, %s3777_s9, %s368_s11, %s4546_s19, %s4546_s19, %s4545_s16  }
  0xbd   : > { %s2516_s27 = sshll.u32 %s3415_s21, 10  ;;  %s412_s10 = scalar_lea.vmem [#allocation10], %s3665_s13 }
  0xbe   : > { %s3814_s12 = scalar_lea.hbm %s4481_s2, %s2516_s27  ;;  %s419_s20 = sshll.u32 %s412_s10, 4  ;;  %s3817_s20 = int_to_ptr.vmem [resolvable:$true] %s419_s20 }
  0xbf   : > { %s3225_s6 = scalar_lea.hbm %s3814_s12, 1024  ;;  %p4554_p0 = pneg %p3679_p13 }
  0xc0   : > { %p3226_p10 = scmp.ne.s32.totalorder %s3814_s12, %s3225_s6  ;;  %s3230_s11 = scalar_lea.hbm %s4481_s2, 2048 }
  0xc1   : > { %p3231_p2 = scmp.lt.u32.totalorder %s3814_s12, %s4481_s2  ;;  %p3232_p7 = scmp.lt.u32.totalorder %s3230_s11, %s3225_s6 }
  0xc2   : > { %p3228_p6 = pnand %p3226_p10, %p4554_p0  ;;  %p3234_p12 = scmp.lt.u32.totalorder %s3225_s6, %s3814_s12 }
  0xc3   : > { %p3233_p4 = por %p3232_p7, %p3231_p2 }
  0xc4   : > { %p3229_p9 = pneg %p3228_p6 }
  0xc5   : > { %p3235_p5 = por %p3234_p12, %p3233_p4 }
  0xc7   : > { %p3236_p1 = pnand %p3235_p5, %p3229_p9 }
  0xc9   : > { %3239 = shalt.err (!%p3236_p1)
}
  0xca   : > { %s3240_s13 = scalar_lea.vmem %s3817_s20, 1024  ;;  %p4555_p10 = pmov %p4554_p0 }
  0xcb   : > { %p3241_p3 = scmp.ne.s32.totalorder %s3817_s20, %s3240_s13  ;;  %s3433_s4 = smov [#allocation10]  }
  0xcc   : > { %s3245_s10 = sshll.u32 %s3433_s4, 4  ;;  %s3246_s10 = int_to_ptr.vmem [resolvable:$false] %s3245_s10 }
  0xcd   : > { %p3243_p0 = pnand %p3241_p3, %p4555_p10  ;;  %s3247_s7 = scalar_lea.vmem %s3246_s10, 2048 }
  0xce   : > { %p3248_p8 = scmp.lt.s32.totalorder %s3817_s20, %s3246_s10  ;;  %p3249_p2 = scmp.lt.s32.totalorder %s3247_s7, %s3240_s13 }
  0xcf   : > { %p3244_p6 = pneg %p3243_p0 }
  0xd0   : > { %p3250_p7 = por %p3249_p2, %p3248_p8 }
  0xd2   : > { %p3251_p4 = pnand %p3250_p7, %p3244_p6 }
  0xd4   : > { %3254 = shalt.err (!%p3251_p4)
}
  0xd5   : > { %2816 = dma.hbm_to_vmem [thread:$0]  (!%p3679_p13), %s3814_s12, 1024, %s3817_s20, %s3687_s28, %s4546_s19, %s4546_s19, %s4545_s16  }
  0xd6   : > { %s2445_s6 = sshll.u32 %s3747_s30, 7  ;;  %s2517_s9 = sshll.u32 %s3419_s22, 11 }
  0xd7   : > { %s3851_s5 = scalar_lea.hbm %s4482_s3, %s2517_s9  ;;  %s433_s25 = scalar_lea.vmem [#allocation11], %s2445_s6 }
  0xd8   : > { %s440_s13 = sshll.u32 %s433_s25, 4  ;;  %s4556_s4 = sand.u32 1, %s3423_s23   ;;  %s3853_s13 = int_to_ptr.vmem [resolvable:$true] %s440_s13 }
  0xd9   : > { %s3857_s10 = scalar_lea.sflag [#allocation12], %s4556_s4  ;;  %s3255_s7 = scalar_lea.hbm %s3851_s5, 2048 }
  0xda   : > { %p3256_p13 = scmp.ne.s32.totalorder %s3851_s5, %s3255_s7  ;;  %p4557_p8 = pneg %p3770_p11 }
  0xdb   : > { %s3260_s19 = scalar_lea.hbm %s4482_s3, 4096  ;;  %p3261_p5 = scmp.lt.u32.totalorder %s3851_s5, %s4482_s3 }
  0xdc   : > { %p3258_p9 = pnand %p3256_p13, %p4557_p8  ;;  %p3262_p1 = scmp.lt.u32.totalorder %s3260_s19, %s3255_s7 }
  0xdd   : > { %p3264_p10 = scmp.lt.u32.totalorder %s3255_s7, %s3851_s5 }
  0xde   : > { %p3259_p12 = pneg %p3258_p9  ;;  %p3263_p3 = por %p3262_p1, %p3261_p5 }
  0xe0   : > { %p3265_p0 = por %p3264_p10, %p3263_p3 }
  0xe2   : > { %p3266_p6 = pnand %p3265_p0, %p3259_p12 }
  0xe4   : > { %3269 = shalt.err (!%p3266_p6)
}
  0xe5   : > { %s3270_s20 = scalar_lea.vmem %s3853_s13, 2048  ;;  %p4558_p7 = pmov %p4557_p8 }
  0xe6   : > { %p3271_p2 = scmp.ne.s32.totalorder %s3853_s13, %s3270_s20  ;;  %s3434_s6 = smov [#allocation11]  }
  0xe7   : > { %s3275_s9 = sshll.u32 %s3434_s6, 4  ;;  %s3276_s9 = int_to_ptr.vmem [resolvable:$false] %s3275_s9 }
  0xe8   : > { %p3273_p4 = pnand %p3271_p2, %p4558_p7  ;;  %s3277_s11 = scalar_lea.vmem %s3276_s9, 4096 }
  0xe9   : > { %p3278_p8 = scmp.lt.s32.totalorder %s3853_s13, %s3276_s9  ;;  %p3279_p9 = scmp.lt.s32.totalorder %s3277_s11, %s3270_s20 }
  0xea   : > { %p3274_p13 = pneg %p3273_p4 }
  0xeb   : > { %p3280_p5 = por %p3279_p9, %p3278_p8 }
  0xed   : > { %p3281_p1 = pnand %p3280_p5, %p3274_p13 }
  0xef   : > { %3284 = shalt.err (!%p3281_p1)
}
  0xf0   : > { %s3435_s27 = smov 8   ;;  %s4559_s25 = smov 128  }
  0xf1   : > { %2819 = dma.hbm_to_vmem [thread:$0]  (!%p3770_p11), %s3851_s5, 2048, %s3853_s13, %s3857_s10, %s4559_s25, %s4559_s25, %s3435_s27  }
  0xf2   : > { %p4560_p12 = scmp.ne.s32.totalorder %s4534_s29, 0 }
  0xf3   : > { %s4561_s4 = sld [smem:[#allocation29_spill]] (!%p4560_p12)  ;;  %s3888_s7 = sand.u32 (!%p4560_p12), 1, %s3399_s17  }
  0xf4   : > { %452 = sbr.rel (%p4560_p12) target bundleno = 1923 (0x783), region = 60  ;;  %s2449_s28 = sshll.u32 (!%p4560_p12), %s3888_s7, 6 }
  0xf5   : > { %s455_s16 = scalar_lea.sflag (!%p4560_p12), [#allocation6], %s3888_s7  ;;  %s3892_s19 = scalar_lea.vmem (!%p4560_p12), [#allocation5], %s2449_s28 }
  0xf9   : > { %p4562_p3 = scmp.ne.s32.totalorder (!%p4560_p12), %s4561_s4, 0 }
  0xfb   : > { %3358 = dma.done.wait (%p4562_p3), %s455_s16, 1024  }
  0xfc   : > { %3360 = vsyncadd (%p4562_p3), %s455_s16, 4294966272  ;;  %s4563_s1 = sld [smem:[#allocation24_spill]]  ;;  %s463_s29 = sand.u32 1, %s3552_s24  }
  0xfd   : > { %s4564_s5 = sld [smem:[#allocation30_spill]]  ;;  %s464_s30 = scalar_lea.sflag [#allocation9], %s463_s29 }
 0x102   : > { %s465_s13 = sand.u32 1, %s4563_s1  }
 0x103   : > { %s2450_s10 = sshll.u32 %s465_s13, 6  ;;  %p4565_p11 = scmp.ne.s32.totalorder %s4564_s5, 0 }
 0x104   : > { %s3900_s12 = scalar_lea.vmem [#allocation8], %s2450_s10 }
 0x105   : > { %3362 = dma.done.wait (%p4565_p11), %s464_s30, 2048  }
 0x106   : > { %3364 = vsyncadd (%p4565_p11), %s464_s30, 4294965248  ;;  %s2452_s20 = sshll.u32 %s3888_s7, 7  ;;  %s3907_s6 = scalar_lea.vmem [#allocation10], %s2450_s10 }
 0x107   : > { %s482_s9 = scalar_lea.sflag [#allocation12], %s463_s29  ;;  %s3909_s11 = scalar_lea.vmem [#allocation11], %s2452_s20 }
 0x108   : > { %3366 = dma.done.wait (%p4562_p3), %s482_s9, 2048  }
 0x109   : > { %3368 = vsyncadd (%p4562_p3), %s482_s9, 4294965248  ;;  %p4566_p10 = scmp.eq.s32.totalorder %s3552_s24, 0 }
 0x10b   : > { %3370 = dma.done.wait (%p4566_p10), [#allocation12], 1024   ;;  %p4567_p0 = pmov %p4566_p10 }
 0x10d   : > { %3372 = vsyncadd (%p4567_p0), [#allocation12], 4294966272  ;;  %p4568_p6 = pmov %p4567_p0 }
 0x10e   : > { %p4569_p2 = pmov %p4567_p0 }
 0x10f   : > { %3374 = dma.done.wait (%p4568_p6), [#allocation15], 2048  }
 0x110   : > { %3376 = vsyncadd (%p4569_p2), [#allocation15], 4294965248  ;;  %s3923_s27 = scalar_lea.vmem [#allocation17], %s2452_s20  ;;  %s4570_s25 = sld [smem:[#allocation27_spill]] }
 0x116   : > { %p2457_p7 = scmp.ne.s32.totalorder %s4570_s25, 0 }
 0x117   : > { %vm558_vm0 = vcmask (!%p2457_p7), 7168   ;;  %v3436_v0 = vmov (!%p2457_p7), -inf   ;;  %v3437_v1 = vmov (!%p2457_p7), 0.0  }
 0x118   : > { %557 = sbr.rel (%p2457_p7) target bundleno = 304 (0x130), region = 92  ;;  %559 = vst.msk [vmem:[#allocation2] sm:$0xff] (!%p2457_p7), %vm558_vm0, %v3436_v0  ;;  %560 = vst.msk [vmem:[#allocation2 + $0x8] sm:$0xff] (!%p2457_p7), %vm558_vm0, %v3436_v0 }
 0x119   : > { %561 = vst.msk [vmem:[#allocation2 + $0x10] sm:$0xff] (!%p2457_p7), %vm558_vm0, %v3436_v0  ;;  %562 = vst.msk [vmem:[#allocation2 + $0x18] sm:$0xff] (!%p2457_p7), %vm558_vm0, %v3436_v0 }
 0x11a   : > { %563 = vst.msk [vmem:[#allocation2 + $0x20] sm:$0xff] (!%p2457_p7), %vm558_vm0, %v3436_v0  ;;  %564 = vst.msk [vmem:[#allocation2 + $0x28] sm:$0xff] (!%p2457_p7), %vm558_vm0, %v3436_v0 }
 0x11b   : > { %565 = vst.msk [vmem:[#allocation2 + $0x30] sm:$0xff] (!%p2457_p7), %vm558_vm0, %v3436_v0  ;;  %566 = vst.msk [vmem:[#allocation2 + $0x38] sm:$0xff] (!%p2457_p7), %vm558_vm0, %v3436_v0 }
 0x11c   : > { %567 = vst.msk [vmem:[#allocation2 + $0x40] sm:$0xff] (!%p2457_p7), %vm558_vm0, %v3436_v0  ;;  %568 = vst.msk [vmem:[#allocation2 + $0x48] sm:$0xff] (!%p2457_p7), %vm558_vm0, %v3436_v0 }
 0x11d   : > { %569 = vst.msk [vmem:[#allocation2 + $0x50] sm:$0xff] (!%p2457_p7), %vm558_vm0, %v3436_v0  ;;  %570 = vst.msk [vmem:[#allocation2 + $0x58] sm:$0xff] (!%p2457_p7), %vm558_vm0, %v3436_v0 }
 0x11e   : > { %571 = vst.msk [vmem:[#allocation2 + $0x60] sm:$0xff] (!%p2457_p7), %vm558_vm0, %v3436_v0  ;;  %572 = vst.msk [vmem:[#allocation2 + $0x68] sm:$0xff] (!%p2457_p7), %vm558_vm0, %v3436_v0 }
 0x11f   : > { %573 = vst.msk [vmem:[#allocation2 + $0x70] sm:$0xff] %vm558_vm0, %v3436_v0  ;;  %574 = vst.msk [vmem:[#allocation2 + $0x78] sm:$0xff] %vm558_vm0, %v3436_v0 }
 0x120   : > { %575 = vst.msk [vmem:[#allocation3] sm:$0xff] %vm558_vm0, %v3437_v1  ;;  %576 = vst.msk [vmem:[#allocation3 + $0x8] sm:$0xff] %vm558_vm0, %v3437_v1 }
 0x121   : > { %577 = vst.msk [vmem:[#allocation3 + $0x10] sm:$0xff] %vm558_vm0, %v3437_v1  ;;  %578 = vst.msk [vmem:[#allocation3 + $0x18] sm:$0xff] %vm558_vm0, %v3437_v1 }
 0x122   : > { %579 = vst.msk [vmem:[#allocation3 + $0x20] sm:$0xff] %vm558_vm0, %v3437_v1  ;;  %580 = vst.msk [vmem:[#allocation3 + $0x28] sm:$0xff] %vm558_vm0, %v3437_v1 }
 0x123   : > { %581 = vst.msk [vmem:[#allocation3 + $0x30] sm:$0xff] %vm558_vm0, %v3437_v1  ;;  %582 = vst.msk [vmem:[#allocation3 + $0x38] sm:$0xff] %vm558_vm0, %v3437_v1 }
 0x124   : > { %583 = vst.msk [vmem:[#allocation3 + $0x40] sm:$0xff] %vm558_vm0, %v3437_v1  ;;  %584 = vst.msk [vmem:[#allocation3 + $0x48] sm:$0xff] %vm558_vm0, %v3437_v1 }
 0x125   : > { %585 = vst.msk [vmem:[#allocation3 + $0x50] sm:$0xff] %vm558_vm0, %v3437_v1  ;;  %586 = vst.msk [vmem:[#allocation3 + $0x58] sm:$0xff] %vm558_vm0, %v3437_v1 }
 0x126   : > { %587 = vst.msk [vmem:[#allocation3 + $0x60] sm:$0xff] %vm558_vm0, %v3437_v1  ;;  %588 = vst.msk [vmem:[#allocation3 + $0x68] sm:$0xff] %vm558_vm0, %v3437_v1 }
 0x127   : > { %589 = vst.msk [vmem:[#allocation3 + $0x70] sm:$0xff] %vm558_vm0, %v3437_v1  ;;  %590 = vst.msk [vmem:[#allocation3 + $0x78] sm:$0xff] %vm558_vm0, %v3437_v1 }
 0x128   : > { %591 = vst [vmem:[#allocation4] sm:$0xff] %v3437_v1  ;;  %592 = vst [vmem:[#allocation4 + $0x8] sm:$0xff] %v3437_v1 }
 0x129   : > { %593 = vst [vmem:[#allocation4 + $0x10] sm:$0xff] %v3437_v1  ;;  %594 = vst [vmem:[#allocation4 + $0x18] sm:$0xff] %v3437_v1 }
 0x12a   : > { %595 = vst [vmem:[#allocation4 + $0x20] sm:$0xff] %v3437_v1  ;;  %596 = vst [vmem:[#allocation4 + $0x28] sm:$0xff] %v3437_v1 }
 0x12b   : > { %597 = vst [vmem:[#allocation4 + $0x30] sm:$0xff] %v3437_v1  ;;  %598 = vst [vmem:[#allocation4 + $0x38] sm:$0xff] %v3437_v1 }
 0x12c   : > { %599 = vst [vmem:[#allocation4 + $0x40] sm:$0xff] %v3437_v1  ;;  %600 = vst [vmem:[#allocation4 + $0x48] sm:$0xff] %v3437_v1 }
 0x12d   : > { %601 = vst [vmem:[#allocation4 + $0x50] sm:$0xff] %v3437_v1  ;;  %602 = vst [vmem:[#allocation4 + $0x58] sm:$0xff] %v3437_v1 }
 0x12e   : > { %603 = vst [vmem:[#allocation4 + $0x60] sm:$0xff] %v3437_v1  ;;  %604 = vst [vmem:[#allocation4 + $0x68] sm:$0xff] %v3437_v1 }
 0x12f   : > { %605 = vst [vmem:[#allocation4 + $0x70] sm:$0xff] %v3437_v1  ;;  %606 = vst [vmem:[#allocation4 + $0x78] sm:$0xff] %v3437_v1 }
 0x130 PF: > { %v2935_v2 = vld [vmem:[%s3900_s12] sm:$0xff]   ;;  %v2936_v3 = vld [vmem:[%s3900_s12 + $0x8] sm:$0xff]   ;;  %v2937_v4 = vld [vmem:[%s3900_s12 + $0x10] sm:$0xff]   ;;  %v3438_v27 = vmov 0   ;;  %vm1152_vm1 = vcmask 7168   ;;  %s4571_s24 = sld [smem:[#allocation27_spill]] }
 0x131   : > { %2599 = vmatprep.subr.bf16.mxu0 %v2935_v2  ;;  %v2938_v5 = vld [vmem:[%s3900_s12 + $0x18] sm:$0xff]   ;;  %v2943_v6 = vld [vmem:[%s3892_s19] sm:$0xff]   ;;  %v2940_v8 = vld [vmem:[%s3900_s12 + $0x28] sm:$0xff]   ;;  %2934 = vset.pattern.permute.xlu1 %v3438_v27 }
 0x132   : > { %2600 = vmatpush3.bf16.msra.mxu0 %v2935_v2  ;;  %2615 = vmatprep.mubr.bf16.mxu0 %v2943_v6  ;;  %v2939_v7 = vld [vmem:[%s3900_s12 + $0x20] sm:$0xff]   ;;  %v2941_v9 = vld [vmem:[%s3900_s12 + $0x30] sm:$0xff]   ;;  %v2942_v10 = vld [vmem:[%s3900_s12 + $0x38] sm:$0xff]  }
 0x133   : > { %2601 = vmatprep.subr.bf16.mxu0 %v2936_v3  ;;  %v2944_v11 = vld [vmem:[%s3892_s19 + $0x8] sm:$0xff]   ;;  %v2945_v12 = vld [vmem:[%s3892_s19 + $0x10] sm:$0xff]   ;;  %v2946_v13 = vld [vmem:[%s3892_s19 + $0x18] sm:$0xff]   ;;  %2933 = vset.pattern.permute.xlu0 %v3438_v27 }
 0x134   : > { %v2947_v14 = vld [vmem:[%s3892_s19 + $0x20] sm:$0xff]   ;;  %v2948_v15 = vld [vmem:[%s3892_s19 + $0x28] sm:$0xff]   ;;  %v2949_v16 = vld [vmem:[%s3892_s19 + $0x30] sm:$0xff]  }
 0x135   : > { %v2950_v17 = vld [vmem:[%s3892_s19 + $0x38] sm:$0xff]   ;;  %v2951_v35 = vld [vmem:[%s3907_s6] sm:$0xff]   ;;  %v2952_v36 = vld [vmem:[%s3907_s6 + $0x8] sm:$0xff]  }
 0x136   : > { %2602 = vmatpush3.bf16.msra.mxu0 %v2936_v3  ;;  %2631 = vmatprep.subr.bf16.mxu1 %v2951_v35  ;;  %v4024_v37 = vld [vmem:[#allocation2 + $0x10] sm:$0xff]  ;;  %v4026_v38 = vld [vmem:[#allocation2] sm:$0xff]  ;;  %v4034_v43 = vld [vmem:[#allocation2 + $0x18] sm:$0xff]  ;;  %p2482_p4 = scmp.ne.s32.totalorder %s4571_s24, 1 }
 0x137   : > { %2603 = vmatprep.subr.bf16.mxu0 %v2937_v4  ;;  %2632 = vmatpush3.bf16.msra.mxu1 %v2951_v35  ;;  %v4039_v44 = vld [vmem:[#allocation2 + $0x8] sm:$0xff]  ;;  %v2953_v45 = vld [vmem:[%s3907_s6 + $0x10] sm:$0xff]   ;;  %v4054_v50 = vld [vmem:[#allocation2 + $0x20] sm:$0xff]  ;;  %s4572_s16 = sld [smem:[#allocation36_spill]] (!%p2482_p4)  ;;  %s4573_s5 = sld [smem:[#allocation38_spill]] (!%p2482_p4) }
 0x138   : > { %2633 = vmatprep.subr.bf16.mxu1 %v2952_v36  ;;  %v2954_v51 = vld [vmem:[%s3907_s6 + $0x18] sm:$0xff]   ;;  %v4068_v57 = vld [vmem:[#allocation2 + $0x30] sm:$0xff]  ;;  %v2955_v58 = vld [vmem:[%s3907_s6 + $0x20] sm:$0xff]   ;;  %s4574_s10 = sld [smem:[#allocation39_spill]] (!%p2482_p4) }
 0x139   : > { %v4059_v52 = vld [vmem:[#allocation2 + $0x38] sm:$0xff]  ;;  %v4073_v59 = vld [vmem:[#allocation2 + $0x28] sm:$0xff]  ;;  %v4083_v0 = vld [vmem:[#allocation2 + $0x40] sm:$0xff] }
 0x13a   : > { %2604 = vmatpush3.bf16.msra.mxu0 %v2937_v4  ;;  %v2956_v1 = vld [vmem:[%s3907_s6 + $0x28] sm:$0xff]   ;;  %v4089_v2 = vld [vmem:[#allocation2 + $0x58] sm:$0xff] }
 0x13b   : > { %2605 = vmatprep.subr.bf16.mxu0 %v2938_v5  ;;  %2634 = vmatpush3.bf16.msra.mxu1 %v2952_v36 }
 0x13c   : > { %2635 = vmatprep.subr.bf16.mxu1 %v2953_v45 }
 0x13e   : > { %2606 = vmatpush3.bf16.msra.mxu0 %v2938_v5 }
 0x13f   : > { %2607 = vmatprep.subr.bf16.mxu0 %v2939_v7  ;;  %2636 = vmatpush3.bf16.msra.mxu1 %v2953_v45  ;;  %v845_v45 = vld [vmem:[#allocation2 + $0x68] sm:$0xff] }
 0x140   : > { %2637 = vmatprep.subr.bf16.mxu1 %v2954_v51 }
 0x142   : > { %2608 = vmatpush3.bf16.msra.mxu0 %v2939_v7  ;;  %v4099_v7 = vld [vmem:[#allocation2 + $0x50] sm:$0xff] }
 0x143   : > { %2609 = vmatprep.subr.bf16.mxu0 %v2940_v8  ;;  %2638 = vmatpush3.bf16.msra.mxu1 %v2954_v51 }
 0x144   : > { %2639 = vmatprep.subr.bf16.mxu1 %v2955_v58 }
 0x146   : > { %2610 = vmatpush3.bf16.msra.mxu0 %v2940_v8  ;;  %v2957_v8 = vld [vmem:[%s3907_s6 + $0x30] sm:$0xff]  }
 0x147   : > { %2611 = vmatprep.subr.bf16.mxu0 %v2941_v9  ;;  %2640 = vmatpush3.bf16.msra.mxu1 %v2955_v58 }
 0x148   : > { %2641 = vmatprep.subr.bf16.mxu1 %v2956_v1 }
 0x14a   : > { %2612 = vmatpush3.bf16.msra.mxu0 %v2941_v9  ;;  %v4105_v9 = vld [vmem:[#allocation2 + $0x48] sm:$0xff] }
 0x14b   : > { %2613 = vmatprep.subr.bf16.mxu0 %v2942_v10  ;;  %2642 = vmatpush3.bf16.msra.mxu1 %v2956_v1 }
 0x14c   : > { %2643 = vmatprep.subr.bf16.mxu1 %v2957_v8 }
 0x14e   : > { %2614 = vmatpush3.bf16.msra.mxu0 %v2942_v10 }
 0x14f   : > { %2644 = vmatpush3.bf16.msra.mxu1 %v2957_v8 }
 0x151   : > { %2616 = vmatmul.mubr.bf16.vlgmr.msra.gmra.mrb[0].mxu0 %v2944_v11 }
 0x152   : > { %2619 = vmatprep.mubr.bf16.mxu0 %v2945_v12 }
 0x159   : > { %2620 = vmatmul.mubr.bf16.gmra.mrb[4].mxu0 %v2946_v13 }
 0x15a   : > { %2623 = vmatprep.mubr.bf16.mxu0 %v2947_v14 }
 0x161   : > { %2624 = vmatmul.mubr.bf16.gmra.mrb[8].mxu0 %v2948_v15  ;;  %v4117_v15 = vld [vmem:[#allocation2 + $0x60] sm:$0xff] }
 0x162   : > { %2627 = vmatprep.mubr.bf16.mxu0 %v2949_v16  ;;  %v2958_v16 = vld [vmem:[%s3907_s6 + $0x38] sm:$0xff]  }
 0x163   : > { %2645 = vmatprep.subr.bf16.mxu1 %v2958_v16 }
 0x164   : > { %2646 = vmatpush3.bf16.msra.mxu1 %v2958_v16 }
 0x169   : > { %2628 = vmatmul.mubr.bf16.gmra.mrb[12].mxu0 %v2950_v17  ;;  %v4123_v17 = vld [vmem:[#allocation2 + $0x78] sm:$0xff] }
 0x224   : > { %v3974_v18 = vpop.f32.mrb[0].mxu0 }
 0x225   : > { %852 = vmax.xlane.f32.xlu1 %v3974_v18  ;;  %v3977_v19 = vpop.f32.mrb[1].mxu0 }
 0x226   : > { %848 = vmax.xlane.f32.xlu0 %v3977_v19  ;;  %v3980_v20 = vpop.f32.mrb[2].mxu0 }
 0x227   : > { %v3982_v21 = vpop.f32.mrb[3].mxu0 }
 0x229   : > { %854 = vmax.xlane.f32.xlu1 %v3980_v20 }
 0x22a   : > { %850 = vmax.xlane.f32.xlu0 %v3982_v21 }
 0x22c   : > { %v3986_v22 = vpop.f32.mrb[4].mxu0 }
 0x22d   : > { %v3988_v23 = vpop.f32.mrb[5].mxu0 }
 0x22e   : > { %856 = vmax.xlane.f32.xlu0 %v3988_v23  ;;  %v3991_v24 = vpop.f32.mrb[6].mxu0 }
 0x22f   : > { %862 = vmax.xlane.f32.xlu1 %v3991_v24  ;;  %v3994_v25 = vpop.f32.mrb[7].mxu0 }
 0x232   : > { %860 = vmax.xlane.f32.xlu0 %v3986_v22 }
 0x233   : > { %858 = vmax.xlane.f32.xlu1 %v3994_v25 }
 0x234   : > { %v3998_v26 = vpop.f32.mrb[8].mxu0 }
 0x235   : > { %v4000_v28 = vpop.f32.mrb[9].mxu0 }
 0x236   : > { %v4002_v29 = vpop.f32.mrb[10].mxu0  ;;  %864 = vmax.xlane.f32.xlu0 %v4000_v28 }
 0x237   : > { %870 = vmax.xlane.f32.xlu1 %v4002_v29  ;;  %v4006_v30 = vpop.f32.mrb[11].mxu0 }
 0x23a   : > { %868 = vmax.xlane.f32.xlu0 %v3998_v26 }
 0x23b   : > { %866 = vmax.xlane.f32.xlu1 %v4006_v30 }
 0x23c   : > { %v4010_v31 = vpop.f32.mrb[12].mxu0 }
 0x23d   : > { %v4012_v32 = vpop.f32.mrb[13].mxu0 }
 0x23e   : > { %v4014_v33 = vpop.f32.mrb[14].mxu0  ;;  %872 = vmax.xlane.f32.xlu0 %v4012_v32 }
 0x23f   : > { %878 = vmax.xlane.f32.xlu1 %v4014_v33  ;;  %v4018_v34 = vpop.f32.mrb[15].mxu0 }
 0x242   : > { %876 = vmax.xlane.f32.xlu0 %v4010_v31 }
 0x243   : > { %874 = vmax.xlane.f32.xlu1 %v4018_v34 }
 0x2b2   : > { %v853_v39 = vpop.xlane.xlu1 %852 }
 0x2b3   : > { %v4029_v40 = vmax.f32 %v4024_v37, %v853_v39  ;;  %v849_v41 = vpop.xlane.xlu0 %848 }
 0x2b4   : > { %v4032_v42 = vmax.f32 %v4026_v38, %v849_v41 }
 0x2b5   : > { %1484 = vst.msk [vmem:[#allocation2 + $0x10] sm:$0xff] %vm1152_vm1, %v4029_v40  ;;  %956 = vperm.xlu1 %2934, %v4029_v40  }
 0x2b6   : > { %1482 = vst.msk [vmem:[#allocation2] sm:$0xff] %vm1152_vm1, %v4032_v42  ;;  %v855_v46 = vpop.xlane.xlu1 %854  ;;  %946 = vperm.xlu0 %2933, %v4032_v42   ;;  %v896_v11 = vsub.f32 %v4026_v38, %v4032_v42  ;;  %v4136_v42 = vld [vmem:[#allocation2 + $0x70] sm:$0xff] }
 0x2b7   : > { %v4046_v47 = vmax.f32 %v4034_v43, %v855_v46  ;;  %v851_v48 = vpop.xlane.xlu0 %850 }
 0x2b8   : > { %v4049_v49 = vmax.f32 %v4039_v44, %v851_v48  ;;  %v912_v35 = vmul.f32 1.442695, %v896_v11 }
 0x2b9   : > { %1485 = vst.msk [vmem:[#allocation2 + $0x18] sm:$0xff] %vm1152_vm1, %v4046_v47  ;;  %961 = vperm.xlu1 %2934, %v4046_v47   ;;  %v899_v36 = vsub.f32 %v4034_v43, %v4046_v47 }
 0x2ba   : > { %1483 = vst.msk [vmem:[#allocation2 + $0x8] sm:$0xff] %vm1152_vm1, %v4049_v49  ;;  %v897_v46 = vsub.f32 %v4039_v44, %v4049_v49  ;;  %2959 = vpow2.f32 %v912_v35 }
 0x2bb   : > { %v857_v53 = vpop.xlane.xlu0 %856  ;;  %v918_v48 = vmul.f32 1.442695, %v899_v36 }
 0x2bc   : > { %v4062_v54 = vmax.f32 %v4054_v50, %v857_v53  ;;  %v863_v55 = vpop.xlane.xlu1 %862 }
 0x2bd   : > { %v4065_v56 = vmax.f32 %v4059_v52, %v863_v55  ;;  %951 = vperm.xlu1 %2934, %v4049_v49   ;;  %v898_v49 = vsub.f32 %v4024_v37, %v4029_v40  ;;  %2961 = vpow2.f32 %v918_v48 }
 0x2be   : > { %1486 = vst.msk [vmem:[#allocation2 + $0x20] sm:$0xff] %vm1152_vm1, %v4062_v54  ;;  %v900_v1 = vsub.f32 %v4054_v50, %v4062_v54 }
 0x2bf   : > { %1489 = vst.msk [vmem:[#allocation2 + $0x38] sm:$0xff] %vm1152_vm1, %v4065_v56  ;;  %v861_v60 = vpop.xlane.xlu0 %860 }
 0x2c0   : > { %v4078_v61 = vmax.f32 %v4068_v57, %v861_v60  ;;  %v859_v62 = vpop.xlane.xlu1 %858  ;;  %v914_v60 = vmul.f32 1.442695, %v897_v46 }
 0x2c1   : > { %v4081_v63 = vmax.f32 %v4073_v59, %v859_v62 }
 0x2c2   : > { %1488 = vst.msk [vmem:[#allocation2 + $0x30] sm:$0xff] %vm1152_vm1, %v4078_v61  ;;  %976 = vperm.xlu1 %2934, %v4078_v61   ;;  %2963 = vpow2.f32 %v914_v60 }
 0x2c3   : > { %1487 = vst.msk [vmem:[#allocation2 + $0x28] sm:$0xff] %vm1152_vm1, %v4081_v63  ;;  %v865_v3 = vpop.xlane.xlu0 %864  ;;  %v901_v51 = vsub.f32 %v4073_v59, %v4081_v63  ;;  %v903_v59 = vsub.f32 %v4059_v52, %v4065_v56  ;;  %v920_v52 = vmul.f32 1.442695, %v900_v1 }
 0x2c4   : > { %v871_v4 = vpop.xlane.xlu1 %870  ;;  %v4094_v5 = vmax.f32 %v4083_v0, %v865_v3  ;;  %v4169_v40 = vpop.eup %2959 }
 0x2c5   : > { %v4097_v6 = vmax.f32 %v4089_v2, %v871_v4  ;;  %v922_v62 = vmul.f32 1.442695, %v901_v51  ;;  %v926_v3 = vmul.f32 1.442695, %v903_v59 }
 0x2c6   : > { %1490 = vst.msk [vmem:[#allocation2 + $0x40] sm:$0xff] %vm1152_vm1, %v4094_v5  ;;  %966 = vperm.xlu1 %2934, %v4062_v54  }
 0x2c7   : > { %1493 = vst.msk [vmem:[#allocation2 + $0x58] sm:$0xff] %vm1152_vm1, %v4097_v6  ;;  %v869_v10 = vpop.xlane.xlu0 %868  ;;  %2965 = vpow2.f32 %v922_v62  ;;  %v907_v37 = vsub.f32 %v4089_v2, %v4097_v6  ;;  %v4177_v4 = vpop.eup %2961 }
 0x2c8   : > { %v867_v12 = vpop.xlane.xlu1 %866  ;;  %v4112_v13 = vmax.f32 %v4099_v7, %v869_v10 }
 0x2c9   : > { %v4115_v14 = vmax.f32 %v4105_v9, %v867_v12  ;;  %v934_v50 = vmul.f32 1.442695, %v907_v37 }
 0x2ca   : > { %1492 = vst.msk [vmem:[#allocation2 + $0x50] sm:$0xff] %vm1152_vm1, %v4112_v13  ;;  %971 = vperm.xlu1 %2934, %v4081_v63   ;;  %v916_v63 = vmul.f32 1.442695, %v898_v49 }
 0x2cb   : > { %1491 = vst.msk [vmem:[#allocation2 + $0x48] sm:$0xff] %vm1152_vm1, %v4115_v14  ;;  %991 = vperm.xlu0 %2933, %v4115_v14   ;;  %v873_v27 = vpop.xlane.xlu0 %872  ;;  %v905_v54 = vsub.f32 %v4105_v9, %v4115_v14  ;;  %v904_v9 = vsub.f32 %v4083_v0, %v4094_v5 }
 0x2cc   : > { %v879_v38 = vpop.xlane.xlu1 %878  ;;  %v4131_v39 = vmax.f32 %v4117_v15, %v873_v27  ;;  %2967 = vpow2.f32 %v916_v63  ;;  %v4183_v8 = vpop.eup %2963 }
 0x2cd   : > { %v4134_v41 = vmax.f32 %v4123_v17, %v879_v38  ;;  %2969 = vpow2.f32 %v926_v3  ;;  %v928_v14 = vmul.f32 1.442695, %v904_v9 }
 0x2ce   : > { %1494 = vst.msk [vmem:[#allocation2 + $0x60] sm:$0xff] %vm1152_vm1, %v4131_v39  ;;  %981 = vperm.xlu1 %2934, %v4065_v56   ;;  %v902_v56 = vsub.f32 %v4068_v57, %v4078_v61  ;;  %2971 = vpow2.f32 %v920_v52  ;;  %v930_v57 = vmul.f32 1.442695, %v905_v54  ;;  %v908_v16 = vsub.f32 %v4117_v15, %v4131_v39 }
 0x2cf   : > { %v911_v43 = vsub.f32 %v4123_v17, %v4134_v41  ;;  %1497 = vst.msk [vmem:[#allocation2 + $0x78] sm:$0xff] %vm1152_vm1, %v4134_v41  ;;  %1001 = vperm.xlu0 %2933, %v4097_v6   ;;  %v877_v47 = vpop.xlane.xlu0 %876  ;;  %v906_v6 = vsub.f32 %v4099_v7, %v4112_v13  ;;  %2973 = vpow2.f32 %v934_v50 }
 0x2d0   : > { %v875_v53 = vpop.xlane.xlu1 %874  ;;  %v4151_v55 = vmax.f32 %v4136_v42, %v877_v47  ;;  %v924_v2 = vmul.f32 1.442695, %v902_v56  ;;  %v936_v27 = vmul.f32 1.442695, %v908_v16 }
 0x2d1   : > { %v893_v58 = vmax.f32 %v845_v45, %v875_v53  ;;  %v4185_v10 = vpop.eup %2965  ;;  %v932_v11 = vmul.f32 1.442695, %v906_v6 }
 0x2d2   : > { %v910_v44 = vsub.f32 %v4136_v42, %v4151_v55  ;;  %1496 = vst.msk [vmem:[#allocation2 + $0x70] sm:$0xff] %vm1152_vm1, %v4151_v55  ;;  %986 = vperm.xlu1 %2934, %v4094_v5   ;;  %2975 = vpow2.f32 %v924_v2 }
 0x2d3   : > { %1495 = vst.msk [vmem:[#allocation2 + $0x68] sm:$0xff] %vm1152_vm1, %v893_v58  ;;  %1011 = vperm.xlu0 %2933, %v893_v58   ;;  %v909_v61 = vsub.f32 %v845_v45, %v893_v58  ;;  %2977 = vpow2.f32 %v930_v57 }
 0x2d4   : > { %2979 = vpow2.f32 %v932_v11 }
 0x2d5   : > { %v938_v7 = vmul.f32 1.442695, %v909_v61 }
 0x2d6   : > { %996 = vperm.xlu1 %2934, %v4112_v13   ;;  %v4191_v12 = vpop.eup %2967 }
 0x2d7   : > { %1021 = vperm.xlu0 %2933, %v4134_v41   ;;  %v4193_v13 = vpop.eup %2969  ;;  %2981 = vpow2.f32 %v938_v7 }
 0x2d8   : > { %v4199_v0 = vpop.eup %2971  ;;  %2983 = vpow2.f32 %v928_v14 }
 0x2d9   : > { %v4201_v5 = vpop.eup %2973  ;;  %2985 = vpow2.f32 %v936_v27 }
 0x2da   : > { %1006 = vperm.xlu1 %2934, %v4131_v39  }
 0x2db   : > { %1187 = vperm.xlu0 %2933, %v4169_v40  }
 0x2dc   : > { %v4205_v35 = vpop.eup %2975 }
 0x2dd   : > { %v4207_v36 = vpop.eup %2977 }
 0x2de   : > { %1016 = vperm.xlu1 %2934, %v4151_v55   ;;  %v4211_v15 = vpop.eup %2979 }
 0x2df   : > { %1202 = vperm.xlu0 %2933, %v4177_v4  }
 0x2e1   : > { %v4213_v38 = vpop.eup %2981 }
 0x2e2   : > { %1192 = vperm.xlu1 %2934, %v4183_v8   ;;  %v4217_v39 = vpop.eup %2983 }
 0x2e3   : > { %1212 = vperm.xlu0 %2933, %v4185_v10   ;;  %v4220_v45 = vpop.eup %2985 }
 0x2e6   : > { %1197 = vperm.xlu1 %2934, %v4191_v12  }
 0x2e7   : > { %1222 = vperm.xlu0 %2933, %v4193_v13  }
 0x2ea   : > { %1207 = vperm.xlu1 %2934, %v4199_v0  }
 0x2eb   : > { %1242 = vperm.xlu0 %2933, %v4201_v5  }
 0x2ee   : > { %1217 = vperm.xlu1 %2934, %v4205_v35  }
 0x2ef   : > { %1232 = vperm.xlu0 %2933, %v4207_v36  }
 0x2f2   : > { %1237 = vperm.xlu1 %2934, %v4211_v15  }
 0x2f3   : > { %1252 = vperm.xlu0 %2933, %v4213_v38  }
 0x2f6   : > { %1227 = vperm.xlu1 %2934, %v4217_v39  }
 0x2fa   : > { %1247 = vperm.xlu1 %2934, %v4220_v45  }
 0x334   : > { %v957_v46 = vpop.permute.xlu1 %956 }
 0x335   : > { %v1026_v47 = vsub.f32 %v3974_v18, %v957_v46  ;;  %v947_v48 = vpop.permute.xlu0 %946 }
 0x336   : > { %v1024_v51 = vsub.f32 %v3977_v19, %v947_v48 }
 0x337   : > { %v1044_v53 = vmul.f32 1.442695, %v1026_v47 }
 0x338   : > { %v1040_v58 = vmul.f32 1.442695, %v1024_v51  ;;  %v962_v49 = vpop.permute.xlu1 %961 }
 0x339   : > { %2987 = vpow2.f32 %v1044_v53  ;;  %v1027_v60 = vsub.f32 %v3980_v20, %v962_v49 }
 0x33a   : > { %2989 = vpow2.f32 %v1040_v58 }
 0x33b   : > { %v1046_v59 = vmul.f32 1.442695, %v1027_v60 }
 0x33c   : > { %v952_v62 = vpop.permute.xlu1 %951 }
 0x33d   : > { %2991 = vpow2.f32 %v1046_v59  ;;  %v1025_v63 = vsub.f32 %v3982_v21, %v952_v62 }
 0x33f   : > { %v1042_v1 = vmul.f32 1.442695, %v1025_v63 }
 0x341   : > { %2993 = vpow2.f32 %v1042_v1  ;;  %v977_v3 = vpop.permute.xlu1 %976 }
 0x342   : > { %v1030_v18 = vsub.f32 %v3986_v22, %v977_v3 }
 0x343   : > { %v2988_v37 = vpop.eup %2987 }
 0x344   : > { %v2990_v52 = vpop.eup %2989  ;;  %v1052_v19 = vmul.f32 1.442695, %v1030_v18  ;;  %1108 = vadd.xlane.f32.xlu0 %v2988_v37 }
 0x345   : > { %1104 = vadd.xlane.f32.xlu1 %v2990_v52  ;;  %v967_v56 = vpop.permute.xlu1 %966 }
 0x346   : > { %2995 = vpow2.f32 %v1052_v19  ;;  %v1028_v20 = vsub.f32 %v3988_v23, %v967_v56 }
 0x347   : > { %v2992_v50 = vpop.eup %2991 }
 0x348   : > { %v1048_v54 = vmul.f32 1.442695, %v1028_v20  ;;  %v1282_v2 = vpack.c.bf16 %v2992_v50, %v2988_v37 }
 0x349   : > { %1110 = vadd.xlane.f32.xlu1 %v2992_v50  ;;  %v972_v6 = vpop.permute.xlu1 %971 }
 0x34a   : > { %2997 = vpow2.f32 %v1048_v54  ;;  %v1029_v21 = vsub.f32 %v3994_v25, %v972_v6  ;;  %v992_v57 = vpop.permute.xlu0 %991 }
 0x34b   : > { %v2994_v61 = vpop.eup %2993  ;;  %v1033_v11 = vsub.f32 %v4006_v30, %v992_v57 }
 0x34c   : > { %v1050_v22 = vmul.f32 1.442695, %v1029_v21  ;;  %1106 = vadd.xlane.f32.xlu0 %v2994_v61  ;;  %v1281_v9 = vpack.c.bf16 %v2994_v61, %v2990_v52 }
 0x34d   : > { %v982_v7 = vpop.permute.xlu1 %981  ;;  %v1058_v46 = vmul.f32 1.442695, %v1033_v11  ;;  %v940_v11 = vmul.f32 1.442695, %v910_v44 }
 0x34e   : > { %2999 = vpow2.f32 %v1050_v22  ;;  %v1031_v14 = vsub.f32 %v3991_v24, %v982_v7  ;;  %v1002_v23 = vpop.permute.xlu0 %1001  ;;  %2647 = vmatprep.mubr.bf16.mxu1 %v1281_v9  ;;  %v942_v7 = vmul.f32 1.442695, %v911_v43 }
 0x34f   : > { %2648 = vmatmul.mubr.bf16.vlgmr.msra.gmra.mrb[0].mxu1 %v1282_v2  ;;  %v1035_v47 = vsub.f32 %v4002_v29, %v1002_v23 }
 0x350   : > { %v2996_v16 = vpop.eup %2995  ;;  %v1054_v27 = vmul.f32 1.442695, %v1031_v14 }
 0x351   : > { %1116 = vadd.xlane.f32.xlu0 %v2996_v16  ;;  %v987_v25 = vpop.permute.xlu1 %986  ;;  %v1062_v58 = vmul.f32 1.442695, %v1035_v47 }
 0x352   : > { %3001 = vpow2.f32 %v1054_v27  ;;  %v1032_v48 = vsub.f32 %v4000_v28, %v987_v25  ;;  %v1012_v51 = vpop.permute.xlu0 %1011 }
 0x353   : > { %3003 = vpow2.f32 %v1058_v46  ;;  %v1037_v24 = vsub.f32 %v4018_v34, %v1012_v51 }
 0x354   : > { %v2998_v53 = vpop.eup %2997  ;;  %v1056_v30 = vmul.f32 1.442695, %v1032_v48 }
 0x355   : > { %1112 = vadd.xlane.f32.xlu0 %v2998_v53  ;;  %v997_v49 = vpop.permute.xlu1 %996  ;;  %v1066_v63 = vmul.f32 1.442695, %v1037_v24 }
 0x356   : > { %3005 = vpow2.f32 %v1056_v30  ;;  %v1034_v60 = vsub.f32 %v3998_v26, %v997_v49  ;;  %v1022_v59 = vpop.permute.xlu0 %1021 }
 0x357   : > { %3007 = vpow2.f32 %v1062_v58  ;;  %v1039_v1 = vsub.f32 %v4014_v33, %v1022_v59  ;;  %v1072_v58 = vld [vmem:[#allocation3] sm:$0xff] }
 0x358   : > { %v3000_v62 = vpop.eup %2999  ;;  %v1060_v29 = vmul.f32 1.442695, %v1034_v60  ;;  %v1088_v60 = vmul.f32 %v4169_v40, %v1072_v58  ;;  %v1078_v40 = vld [vmem:[#allocation3 + $0x30] sm:$0xff] }
 0x359   : > { %v1007_v28 = vpop.permute.xlu1 %1006  ;;  %v1283_v3 = vpack.c.bf16 %v3000_v62, %v2998_v53  ;;  %v1070_v52 = vmul.f32 1.442695, %v1039_v1  ;;  %v1074_v53 = vld [vmem:[#allocation3 + $0x10] sm:$0xff] }
 0x35a   : > { %3009 = vpow2.f32 %v1060_v29  ;;  %v1036_v18 = vsub.f32 %v4012_v32, %v1007_v28  ;;  %v1090_v24 = vmul.f32 %v4191_v12, %v1074_v53  ;;  %v1075_v29 = vld [vmem:[#allocation3 + $0x18] sm:$0xff]  ;;  %v1073_v28 = vld [vmem:[#allocation3 + $0x8] sm:$0xff] }
 0x35b   : > { %2651 = vmatprep.mubr.bf16.mxu1 %v1283_v3  ;;  %3011 = vpow2.f32 %v1066_v63  ;;  %v1091_v1 = vmul.f32 %v4177_v4, %v1075_v29 }
 0x35c   : > { %v3002_v37 = vpop.eup %3001  ;;  %v1064_v34 = vmul.f32 1.442695, %v1036_v18 }
 0x35d   : > { %1118 = vadd.xlane.f32.xlu1 %v3002_v37  ;;  %v1017_v19 = vpop.permute.xlu1 %1016  ;;  %v1284_v26 = vpack.c.bf16 %v3002_v37, %v2996_v16  ;;  %v3004_v20 = vpop.eup %3003  ;;  %v1089_v37 = vmul.f32 %v4183_v8, %v1073_v28  ;;  %v1079_v8 = vld [vmem:[#allocation3 + $0x38] sm:$0xff]  ;;  %v1084_v28 = vld [vmem:[#allocation3 + $0x60] sm:$0xff] }
 0x35e   : > { %3013 = vpow2.f32 %v1064_v34  ;;  %v1038_v56 = vsub.f32 %v4010_v31, %v1017_v19  ;;  %v4251_v16 = vpop.permute.xlu0 %1187 }
 0x35f   : > { %2652 = vmatmul.mubr.bf16.gmra.mrb[4].mxu1 %v1284_v26  ;;  %3015 = vpow2.f32 %v1070_v52  ;;  %v1094_v52 = vmul.f32 %v4205_v35, %v1078_v40  ;;  %v1076_v26 = vld [vmem:[#allocation3 + $0x20] sm:$0xff] }
 0x360   : > { %v3006_v50 = vpop.eup %3005  ;;  %v1068_v33 = vmul.f32 1.442695, %v1038_v56  ;;  %v1092_v4 = vmul.f32 %v4199_v0, %v1076_v26  ;;  %v1170_v26 = vld [vmem:[#allocation4 + $0x8] sm:$0xff] }
 0x361   : > { %1114 = vadd.xlane.f32.xlu1 %v3000_v62  ;;  %v1285_v54 = vpack.c.bf16 %v3004_v20, %v3006_v50  ;;  %v3008_v32 = vpop.eup %3007  ;;  %v4253_v27 = vpop.permute.xlu1 %1192 }
 0x362   : > { %3017 = vpow2.f32 %v1068_v33  ;;  %v4255_v42 = vpop.permute.xlu0 %1202  ;;  %v1095_v33 = vmul.f32 %v4193_v13, %v1079_v8  ;;  %v1080_v13 = vld [vmem:[#allocation3 + $0x40] sm:$0xff]  ;;  %v1266_v8 = vmul.f32 %v4253_v27, %v1170_v26 }
 0x363   : > { %2655 = vmatprep.mubr.bf16.mxu1 %v1285_v54  ;;  %3019 = vpow2.f32 %v940_v11  ;;  %v1081_v11 = vld [vmem:[#allocation3 + $0x48] sm:$0xff] }
 0x364   : > { %v3010_v2 = vpop.eup %3009  ;;  %3021 = vpow2.f32 %v942_v7  ;;  %v1097_v58 = vmul.f32 %v4207_v36, %v1081_v11 }
 0x365   : > { %1126 = vadd.xlane.f32.xlu1 %v3008_v32  ;;  %1124 = vadd.xlane.f32.xlu0 %v3010_v2  ;;  %v1286_v6 = vpack.c.bf16 %v3008_v32, %v3010_v2  ;;  %v3012_v21 = vpop.eup %3011  ;;  %v4257_v55 = vpop.permute.xlu1 %1197  ;;  %v1077_v32 = vld [vmem:[#allocation3 + $0x28] sm:$0xff] }
 0x366   : > { %v4259_v44 = vpop.permute.xlu0 %1212  ;;  %v1093_v35 = vmul.f32 %v4185_v10, %v1077_v32  ;;  %v1096_v10 = vmul.f32 %v4217_v39, %v1080_v13  ;;  %v1085_v39 = vld [vmem:[#allocation3 + $0x68] sm:$0xff] }
 0x367   : > { %2656 = vmatmul.mubr.bf16.gmra.mrb[8].mxu1 %v1286_v6 }
 0x368   : > { %v3014_v57 = vpop.eup %3013 }
 0x369   : > { %1122 = vadd.xlane.f32.xlu1 %v3004_v20  ;;  %1120 = vadd.xlane.f32.xlu0 %v3006_v50  ;;  %v1287_v31 = vpack.c.bf16 %v3012_v21, %v3014_v57  ;;  %v3016_v61 = vpop.eup %3015  ;;  %v4261_v17 = vpop.permute.xlu1 %1207 }
 0x36a   : > { %v4263_v41 = vpop.permute.xlu0 %1222 }
 0x36b   : > { %2659 = vmatprep.mubr.bf16.mxu1 %v1287_v31 }
 0x36c   : > { %v3018_v22 = vpop.eup %3017 }
 0x36d   : > { %1134 = vadd.xlane.f32.xlu1 %v3016_v61  ;;  %1132 = vadd.xlane.f32.xlu0 %v3018_v22  ;;  %v1288_v9 = vpack.c.bf16 %v3016_v61, %v3018_v22  ;;  %v4245_v14 = vpop.eup %3019  ;;  %v4265_v43 = vpop.permute.xlu1 %1217 }
 0x36e   : > { %v4248_v23 = vpop.eup %3021  ;;  %v4267_v46 = vpop.permute.xlu0 %1242 }
 0x36f   : > { %2660 = vmatmul.mubr.bf16.gmra.mrb[12].mxu1 %v1288_v9 }
 0x371   : > { %1130 = vadd.xlane.f32.xlu1 %v3012_v21  ;;  %1128 = vadd.xlane.f32.xlu0 %v3014_v57  ;;  %v4269_v47 = vpop.permute.xlu1 %1237  ;;  %v1082_v21 = vld [vmem:[#allocation3 + $0x50] sm:$0xff]  ;;  %v1083_v57 = vld [vmem:[#allocation3 + $0x58] sm:$0xff] }
 0x372   : > { %v4271_v25 = vpop.permute.xlu0 %1232  ;;  %v1098_v0 = vmul.f32 %v4211_v15, %v1082_v21  ;;  %v1099_v61 = vmul.f32 %v4201_v5, %v1083_v57  ;;  %v1087_v15 = vld [vmem:[#allocation3 + $0x78] sm:$0xff] }
 0x373   : > { %v1103_v29 = vmul.f32 %v4248_v23, %v1087_v15  ;;  %v1176_v21 = vld [vmem:[#allocation4 + $0x38] sm:$0xff] }
 0x374   : > { %v1272_v27 = vmul.f32 %v4263_v41, %v1176_v21  ;;  %v3028_v21 = vld [vmem:[#allocation13 + $0x18] sm:$0xff] (!%p2482_p4)  }
 0x375   : > { %v4273_v48 = vpop.permute.xlu1 %1227 }
 0x376   : > { %v4275_v51 = vpop.permute.xlu0 %1252 }
 0x379   : > { %v4277_v30 = vpop.permute.xlu1 %1247 }
 0x382   : > { %1257 = vperm.xlu1 %2934, %v4245_v14  }
 0x387   : > { %1262 = vperm.xlu0 %2933, %v4248_v23   ;;  %v1171_v23 = vld [vmem:[#allocation4 + $0x10] sm:$0xff] }
 0x3d1   : > { %v1109_v49 = vpop.xlane.xlu0 %1108 }
 0x3d2   : > { %v1138_v59 = vadd.f32 %v1109_v49, %v1090_v24  ;;  %v1105_v62 = vpop.xlane.xlu1 %1104 }
 0x3d3   : > { %v1136_v63 = vadd.f32 %v1105_v62, %v1088_v60  ;;  %v1086_v60 = vld [vmem:[#allocation3 + $0x70] sm:$0xff] }
 0x3d4   : > { %1155 = vst.msk [vmem:[#allocation3 + $0x10] sm:$0xff] %vm1152_vm1, %v1138_v59  ;;  %v1102_v62 = vmul.f32 %v4245_v14, %v1086_v60 }
 0x3d5   : > { %1153 = vst.msk [vmem:[#allocation3] sm:$0xff] %vm1152_vm1, %v1136_v63 }
 0x3d6   : > { %v1111_v3 = vpop.xlane.xlu1 %1110 }
 0x3d7   : > { %v1139_v18 = vadd.f32 %v1111_v3, %v1091_v1 }
 0x3d9   : > { %1156 = vst.msk [vmem:[#allocation3 + $0x18] sm:$0xff] %vm1152_vm1, %v1139_v18  ;;  %v1107_v12 = vpop.xlane.xlu0 %1106  ;;  %v1100_v18 = vmul.f32 %v4220_v45, %v1084_v28 }
 0x3da   : > { %v1137_v34 = vadd.f32 %v1107_v12, %v1089_v37  ;;  %v1101_v37 = vmul.f32 %v4213_v38, %v1085_v39 }
 0x3dc   : > { %1154 = vst.msk [vmem:[#allocation3 + $0x8] sm:$0xff] %vm1152_vm1, %v1137_v34 }
 0x3de   : > { %v1117_v19 = vpop.xlane.xlu0 %1116 }
 0x3df   : > { %v1142_v56 = vadd.f32 %v1117_v19, %v1094_v52  ;;  %v1169_v52 = vld [vmem:[#allocation4] sm:$0xff]  ;;  %v1172_v19 = vld [vmem:[#allocation4 + $0x18] sm:$0xff] }
 0x3e0   : > { %v1268_v45 = vmul.f32 %v4255_v42, %v1172_v19 }
 0x3e1   : > { %1159 = vst.msk [vmem:[#allocation3 + $0x30] sm:$0xff] %vm1152_vm1, %v1142_v56  ;;  %v1267_v56 = vmul.f32 %v4257_v55, %v1171_v23  ;;  %v1173_v55 = vld [vmem:[#allocation4 + $0x20] sm:$0xff] }
 0x3e2   : > { %v1113_v20 = vpop.xlane.xlu0 %1112  ;;  %v1269_v42 = vmul.f32 %v4261_v17, %v1173_v55  ;;  %v1178_v17 = vld [vmem:[#allocation4 + $0x48] sm:$0xff] }
 0x3e3   : > { %v1140_v50 = vadd.f32 %v1113_v20, %v1092_v4  ;;  %v1265_v4 = vmul.f32 %v4251_v16, %v1169_v52  ;;  %v1174_v16 = vld [vmem:[#allocation4 + $0x28] sm:$0xff] }
 0x3e5   : > { %1157 = vst.msk [vmem:[#allocation3 + $0x20] sm:$0xff] %vm1152_vm1, %v1140_v50 }
 0x3ea   : > { %v1119_v54 = vpop.xlane.xlu1 %1118 }
 0x3eb   : > { %v1143_v2 = vadd.f32 %v1119_v54, %v1095_v33 }
 0x3ed   : > { %1160 = vst.msk [vmem:[#allocation3 + $0x38] sm:$0xff] %vm1152_vm1, %v1143_v2 }
 0x3ee   : > { %v1115_v6 = vpop.xlane.xlu1 %1114 }
 0x3ef   : > { %v1141_v31 = vadd.f32 %v1115_v6, %v1093_v35  ;;  %v1175_v6 = vld [vmem:[#allocation4 + $0x30] sm:$0xff] }
 0x3f0   : > { %v1271_v57 = vmul.f32 %v4265_v43, %v1175_v6  ;;  %v1180_v43 = vld [vmem:[#allocation4 + $0x58] sm:$0xff] }
 0x3f1   : > { %1158 = vst.msk [vmem:[#allocation3 + $0x28] sm:$0xff] %vm1152_vm1, %v1141_v31 }
 0x3f2   : > { %v1125_v22 = vpop.xlane.xlu0 %1124  ;;  %v1127_v9 = vpop.xlane.xlu1 %1126 }
 0x3f3   : > { %v1146_v7 = vadd.f32 %v1125_v22, %v1098_v0  ;;  %v1147_v53 = vadd.f32 %v1127_v9, %v1099_v61  ;;  %v1270_v22 = vmul.f32 %v4259_v44, %v1174_v16  ;;  %v1276_v44 = vmul.f32 %v4267_v46, %v1180_v43 }
 0x3f5   : > { %1163 = vst.msk [vmem:[#allocation3 + $0x50] sm:$0xff] %vm1152_vm1, %v1146_v7  ;;  %1164 = vst.msk [vmem:[#allocation3 + $0x58] sm:$0xff] %vm1152_vm1, %v1147_v53  ;;  %v1179_v53 = vld [vmem:[#allocation4 + $0x50] sm:$0xff] }
 0x3f6   : > { %v1121_v24 = vpop.xlane.xlu0 %1120  ;;  %v1123_v49 = vpop.xlane.xlu1 %1122 }
 0x3f7   : > { %v1144_v59 = vadd.f32 %v1121_v24, %v1096_v10  ;;  %v1145_v5 = vadd.f32 %v1123_v49, %v1097_v58  ;;  %v1177_v58 = vld [vmem:[#allocation4 + $0x40] sm:$0xff]  ;;  %v1275_v24 = vmul.f32 %v4269_v47, %v1179_v53  ;;  %v1184_v47 = vld [vmem:[#allocation4 + $0x78] sm:$0xff] }
 0x3f8   : > { %v1273_v41 = vmul.f32 %v4273_v48, %v1177_v58 }
 0x3f9   : > { %1161 = vst.msk [vmem:[#allocation3 + $0x40] sm:$0xff] %vm1152_vm1, %v1144_v59  ;;  %1162 = vst.msk [vmem:[#allocation3 + $0x48] sm:$0xff] %vm1152_vm1, %v1145_v5  ;;  %v1274_v59 = vmul.f32 %v4271_v25, %v1178_v17  ;;  %v3031_v17 = vld [vmem:[#allocation13 + $0x30] sm:$0xff] (!%p2482_p4)  }
 0x3fa   : > { %v1133_v63 = vpop.xlane.xlu0 %1132  ;;  %v1135_v1 = vpop.xlane.xlu1 %1134 }
 0x3fb   : > { %v1150_v3 = vadd.f32 %v1133_v63, %v1102_v62  ;;  %v1151_v36 = vadd.f32 %v1135_v1, %v1103_v29  ;;  %v1183_v1 = vld [vmem:[#allocation4 + $0x70] sm:$0xff] }
 0x3fd   : > { %1167 = vst.msk [vmem:[#allocation3 + $0x70] sm:$0xff] %vm1152_vm1, %v1150_v3  ;;  %1168 = vst.msk [vmem:[#allocation3 + $0x78] sm:$0xff] %vm1152_vm1, %v1151_v36  ;;  %v1181_v3 = vld [vmem:[#allocation4 + $0x60] sm:$0xff]  ;;  %v1182_v36 = vld [vmem:[#allocation4 + $0x68] sm:$0xff] }
 0x3fe   : > { %v1129_v12 = vpop.xlane.xlu0 %1128  ;;  %v1131_v34 = vpop.xlane.xlu1 %1130 }
 0x3ff   : > { %v1148_v40 = vadd.f32 %v1129_v12, %v1100_v18  ;;  %v1149_v14 = vadd.f32 %v1131_v34, %v1101_v37  ;;  %v1277_v18 = vmul.f32 %v4277_v30, %v1181_v3  ;;  %v1518_v30 = vld [vmem:[#allocation3] sm:$0xff] (!%p2482_p4) }
 0x400   : > { %v1526_v55 = vld [vmem:[#allocation3 + $0x40] sm:$0xff] (!%p2482_p4) }
 0x401   : > { %1165 = vst.msk [vmem:[#allocation3 + $0x60] sm:$0xff] %vm1152_vm1, %v1148_v40  ;;  %1166 = vst.msk [vmem:[#allocation3 + $0x68] sm:$0xff] %vm1152_vm1, %v1149_v14  ;;  %v1278_v40 = vmul.f32 %v4275_v51, %v1182_v36  ;;  %v1519_v51 = vld [vmem:[#allocation3 + $0x8] sm:$0xff] (!%p2482_p4) }
 0x402   : > { %v1258_v28 = vpop.permute.xlu1 %1257 }
 0x403   : > { %v1279_v46 = vmul.f32 %v1258_v28, %v1183_v1  ;;  %v3037_v1 = vld [vmem:[#allocation14 + $0x20] sm:$0xff] (!%p2482_p4)   ;;  %v3038_v28 = vld [vmem:[#allocation14 + $0x28] sm:$0xff] (!%p2482_p4)  }
 0x404   : > { %v1533_v53 = vld [vmem:[#allocation3 + $0x78] sm:$0xff] (!%p2482_p4) }
 0x406   : > { %v1263_v48 = vpop.permute.xlu0 %1262 }
 0x407   : > { %v1280_v25 = vmul.f32 %v1263_v48, %v1184_v47 }
 0x422   : > { %v2649_v20 = vpop.f32.mrb[0].mxu1 }
 0x423   : > { %v1452_v38 = vadd.f32 %v2649_v20, %v1267_v56  ;;  %v1387_v50 = vpop.f32.mrb[1].mxu1  ;;  %v1520_v56 = vld [vmem:[#allocation3 + $0x10] sm:$0xff] (!%p2482_p4)  ;;  %v3439_v20 = vmov (!%p2482_p4), 0  }
 0x424   : > { %v1450_v33 = vadd.f32 %v1387_v50, %v1265_v4  ;;  %v2650_v54 = vpop.f32.mrb[2].mxu1  ;;  %v1521_v4 = vld [vmem:[#allocation3 + $0x18] sm:$0xff] (!%p2482_p4)  ;;  %3024 = vset.pattern.permute.xlu1 (!%p2482_p4), %v3439_v20  ;;  %3023 = vset.pattern.permute.xlu0 (!%p2482_p4), %v3439_v20  ;;  %3049 = vrcp.f32 (!%p2482_p4), %v1520_v56  ;;  %v3025_v50 = vld [vmem:[#allocation13] sm:$0xff] (!%p2482_p4)  }
 0x425   : > { %1468 = vst [vmem:[#allocation4 + $0x10] sm:$0xff] %v1452_v38  ;;  %v1453_v32 = vadd.f32 %v2650_v54, %v1268_v45  ;;  %v1390_v2 = vpop.f32.mrb[3].mxu1  ;;  %3051 = vrcp.f32 (!%p2482_p4), %v1518_v30  ;;  %v1523_v45 = vld [vmem:[#allocation3 + $0x28] sm:$0xff] (!%p2482_p4)  ;;  %v1522_v38 = vld [vmem:[#allocation3 + $0x20] sm:$0xff] (!%p2482_p4)  ;;  %2663 = vmatprep.subr.bf16.mxu0 (!%p2482_p4), %v3025_v50  ;;  %v1524_v54 = vld [vmem:[#allocation3 + $0x30] sm:$0xff] (!%p2482_p4) }
 0x426   : > { %1466 = vst [vmem:[#allocation4] sm:$0xff] %v1450_v33  ;;  %v1451_v35 = vadd.f32 %v1390_v2, %v1266_v8  ;;  %3053 = vrcp.f32 (!%p2482_p4), %v1521_v4  ;;  %v3026_v8 = vld [vmem:[#allocation13 + $0x8] sm:$0xff] (!%p2482_p4)   ;;  %v1525_v33 = vld [vmem:[#allocation3 + $0x38] sm:$0xff] (!%p2482_p4)  ;;  %2664 = vmatpush3.bf16.msra.mxu0 (!%p2482_p4), %v3025_v50 }
 0x427   : > { %1469 = vst [vmem:[#allocation4 + $0x18] sm:$0xff] %v1453_v32  ;;  %3055 = vrcp.f32 (!%p2482_p4), %v1519_v51  ;;  %2665 = vmatprep.subr.bf16.mxu0 (!%p2482_p4), %v3026_v8  ;;  %v3027_v32 = vld [vmem:[#allocation13 + $0x10] sm:$0xff] (!%p2482_p4)  }
 0x428   : > { %1467 = vst [vmem:[#allocation4 + $0x8] sm:$0xff] %v1451_v35  ;;  %3057 = vrcp.f32 (!%p2482_p4), %v1523_v45  ;;  %v1527_v35 = vld [vmem:[#allocation3 + $0x48] sm:$0xff] (!%p2482_p4) }
 0x429   : > { %3059 = vrcp.f32 (!%p2482_p4), %v1522_v38 }
 0x42a   : > { %3061 = vrcp.f32 (!%p2482_p4), %v1525_v33  ;;  %2666 = vmatpush3.bf16.msra.mxu0 (!%p2482_p4), %v3026_v8 }
 0x42b   : > { %3063 = vrcp.f32 (!%p2482_p4), %v1524_v54  ;;  %2667 = vmatprep.subr.bf16.mxu0 (!%p2482_p4), %v3027_v32 }
 0x42c   : > { %3065 = vrcp.f32 (!%p2482_p4), %v1527_v35  ;;  %v1504_v47 = vld [vmem:[#allocation4 + $0x10] sm:$0xff] (!%p2482_p4) }
 0x42d   : > { %3067 = vrcp.f32 (!%p2482_p4), %v1526_v55  ;;  %v1502_v36 = vld [vmem:[#allocation4] sm:$0xff] (!%p2482_p4) }
 0x42e   : > { %v3050_v2 = vpop.eup (!%p2482_p4), %3049  ;;  %2668 = vmatpush3.bf16.msra.mxu0 (!%p2482_p4), %v3027_v32  ;;  %v1505_v48 = vld [vmem:[#allocation4 + $0x18] sm:$0xff] (!%p2482_p4) }
 0x42f   : > { %v3052_v6 = vpop.eup (!%p2482_p4), %3051  ;;  %1562 = vperm.xlu1 (!%p2482_p4), %3024, %v3050_v2   ;;  %2669 = vmatprep.subr.bf16.mxu0 (!%p2482_p4), %v3028_v21 }
 0x430   : > { %v3054_v16 = vpop.eup (!%p2482_p4), %3053  ;;  %1552 = vperm.xlu0 (!%p2482_p4), %3023, %v3052_v6  }
 0x432   : > { %v2653_v31 = vpop.f32.mrb[4].mxu1  ;;  %2670 = vmatpush3.bf16.msra.mxu0 (!%p2482_p4), %v3028_v21 }
 0x433   : > { %v1456_v0 = vadd.f32 %v2653_v31, %v1271_v57  ;;  %v1403_v61 = vpop.f32.mrb[5].mxu1  ;;  %v3056_v57 = vpop.eup (!%p2482_p4), %3055  ;;  %1567 = vperm.xlu1 (!%p2482_p4), %3024, %v3054_v16   ;;  %v1528_v31 = vld [vmem:[#allocation3 + $0x50] sm:$0xff] (!%p2482_p4) }
 0x434   : > { %v1454_v9 = vadd.f32 %v1403_v61, %v1269_v42  ;;  %v2654_v13 = vpop.f32.mrb[6].mxu1  ;;  %v1529_v42 = vld [vmem:[#allocation3 + $0x58] sm:$0xff] (!%p2482_p4)  ;;  %1557 = vperm.xlu0 (!%p2482_p4), %3023, %v3056_v57  }
 0x435   : > { %1472 = vst [vmem:[#allocation4 + $0x30] sm:$0xff] %v1456_v0  ;;  %v1457_v11 = vadd.f32 %v2654_v13, %v1272_v27  ;;  %v1406_v7 = vpop.f32.mrb[7].mxu1  ;;  %v3029_v27 = vld [vmem:[#allocation13 + $0x20] sm:$0xff] (!%p2482_p4)   ;;  %v3058_v0 = vpop.eup (!%p2482_p4), %3057  ;;  %3069 = vrcp.f32 (!%p2482_p4), %v1529_v42  ;;  %v3030_v13 = vld [vmem:[#allocation13 + $0x28] sm:$0xff] (!%p2482_p4)  }
 0x436   : > { %1470 = vst [vmem:[#allocation4 + $0x20] sm:$0xff] %v1454_v9  ;;  %v1455_v10 = vadd.f32 %v1406_v7, %v1270_v22  ;;  %v3060_v61 = vpop.eup (!%p2482_p4), %3059  ;;  %v1531_v22 = vld [vmem:[#allocation3 + $0x68] sm:$0xff] (!%p2482_p4)  ;;  %v1530_v9 = vld [vmem:[#allocation3 + $0x60] sm:$0xff] (!%p2482_p4)  ;;  %3071 = vrcp.f32 (!%p2482_p4), %v1528_v31  ;;  %2671 = vmatprep.subr.bf16.mxu0 (!%p2482_p4), %v3029_v27 }
 0x437   : > { %1473 = vst [vmem:[#allocation4 + $0x38] sm:$0xff] %v1457_v11  ;;  %1577 = vperm.xlu1 (!%p2482_p4), %3024, %v3058_v0   ;;  %v3062_v11 = vpop.eup (!%p2482_p4), %3061  ;;  %3073 = vrcp.f32 (!%p2482_p4), %v1531_v22  ;;  %2672 = vmatpush3.bf16.msra.mxu0 (!%p2482_p4), %v3029_v27 }
 0x438   : > { %1471 = vst [vmem:[#allocation4 + $0x28] sm:$0xff] %v1455_v10  ;;  %1572 = vperm.xlu0 (!%p2482_p4), %3023, %v3060_v61   ;;  %v3064_v7 = vpop.eup (!%p2482_p4), %3063  ;;  %3075 = vrcp.f32 (!%p2482_p4), %v1530_v9  ;;  %v1532_v10 = vld [vmem:[#allocation3 + $0x70] sm:$0xff] (!%p2482_p4)  ;;  %2673 = vmatprep.subr.bf16.mxu0 (!%p2482_p4), %v3030_v13 }
 0x439   : > { %v3066_v58 = vpop.eup (!%p2482_p4), %3065  ;;  %3077 = vrcp.f32 (!%p2482_p4), %v1533_v53 }
 0x43a   : > { %v2657_v49 = vpop.f32.mrb[8].mxu1  ;;  %v3068_v43 = vpop.eup (!%p2482_p4), %3067  ;;  %3079 = vrcp.f32 (!%p2482_p4), %v1532_v10 }
 0x43b   : > { %v1460_v60 = vadd.f32 %v2657_v49, %v1275_v24  ;;  %v1419_v15 = vpop.f32.mrb[9].mxu1  ;;  %1587 = vperm.xlu1 (!%p2482_p4), %3024, %v3062_v11   ;;  %2674 = vmatpush3.bf16.msra.mxu0 (!%p2482_p4), %v3030_v13  ;;  %v3032_v49 = vld [vmem:[#allocation13 + $0x38] sm:$0xff] (!%p2482_p4)  }
 0x43c   : > { %v1458_v5 = vadd.f32 %v1419_v15, %v1273_v41  ;;  %v2658_v62 = vpop.f32.mrb[10].mxu1  ;;  %1582 = vperm.xlu0 (!%p2482_p4), %3023, %v3064_v7   ;;  %2675 = vmatprep.subr.bf16.mxu0 (!%p2482_p4), %v3031_v17  ;;  %v1508_v51 = vld [vmem:[#allocation4 + $0x30] sm:$0xff] (!%p2482_p4) }
 0x43d   : > { %1476 = vst [vmem:[#allocation4 + $0x50] sm:$0xff] %v1460_v60  ;;  %v1461_v29 = vadd.f32 %v2658_v62, %v1276_v44  ;;  %v1422_v63 = vpop.f32.mrb[11].mxu1  ;;  %v3034_v62 = vld [vmem:[#allocation14 + $0x8] sm:$0xff] (!%p2482_p4)  }
 0x43e   : > { %1474 = vst [vmem:[#allocation4 + $0x40] sm:$0xff] %v1458_v5  ;;  %v1459_v39 = vadd.f32 %v1422_v63, %v1274_v59  ;;  %v3033_v5 = vld [vmem:[#allocation14] sm:$0xff] (!%p2482_p4)   ;;  %v3036_v63 = vld [vmem:[#allocation14 + $0x18] sm:$0xff] (!%p2482_p4)  }
 0x43f   : > { %1477 = vst [vmem:[#allocation4 + $0x58] sm:$0xff] %v1461_v29  ;;  %1597 = vperm.xlu1 (!%p2482_p4), %3024, %v3066_v58   ;;  %v3070_v24 = vpop.eup (!%p2482_p4), %3069  ;;  %2676 = vmatpush3.bf16.msra.mxu0 (!%p2482_p4), %v3031_v17  ;;  %v3035_v29 = vld [vmem:[#allocation14 + $0x10] sm:$0xff] (!%p2482_p4)   ;;  %v1509_v20 = vld [vmem:[#allocation4 + $0x38] sm:$0xff] (!%p2482_p4) }
 0x440   : > { %1475 = vst [vmem:[#allocation4 + $0x48] sm:$0xff] %v1459_v39  ;;  %1592 = vperm.xlu0 (!%p2482_p4), %3023, %v3068_v43   ;;  %v3072_v41 = vpop.eup (!%p2482_p4), %3071  ;;  %2677 = vmatprep.subr.bf16.mxu0 (!%p2482_p4), %v3032_v49 }
 0x441   : > { %v3074_v44 = vpop.eup (!%p2482_p4), %3073  ;;  %2695 = vmatprep.subr.bf16.mxu1 (!%p2482_p4), %v3033_v5 }
 0x442   : > { %v2661_v37 = vpop.f32.mrb[12].mxu1  ;;  %1501 = sbr.rel (%p2482_p4) target bundleno = 1895 (0x767), region = 96  ;;  %v3076_v60 = vpop.eup (!%p2482_p4), %3075  ;;  %2696 = vmatpush3.bf16.msra.mxu1 (!%p2482_p4), %v3033_v5  ;;  %v3041_v5 = vld [vmem:[#allocation16] sm:$0xff] (!%p2482_p4)  }
 0x443   : > { %v1464_v12 = vadd.f32 %v2661_v37, %v1279_v46  ;;  %v1435_v34 = vpop.f32.mrb[13].mxu1  ;;  %1607 = vperm.xlu1 (!%p2482_p4), %3024, %v3070_v24   ;;  %v3078_v15 = vpop.eup (!%p2482_p4), %3077  ;;  %2678 = vmatpush3.bf16.msra.mxu0 (!%p2482_p4), %v3032_v49  ;;  %v1503_v46 = vld [vmem:[#allocation4 + $0x8] sm:$0xff] (!%p2482_p4) }
 0x444   : > { %v1462_v14 = vadd.f32 %v1435_v34, %v1277_v18  ;;  %v2662_v23 = vpop.f32.mrb[14].mxu1  ;;  %1602 = vperm.xlu0 (!%p2482_p4), %3023, %v3072_v41   ;;  %v3080_v59 = vpop.eup (!%p2482_p4), %3079  ;;  %2697 = vmatprep.subr.bf16.mxu1 (!%p2482_p4), %v3034_v62  ;;  %v1512_v57 = vld [vmem:[#allocation4 + $0x50] sm:$0xff] (!%p2482_p4) }
 0x445   : > { %1480 = vst [vmem:[#allocation4 + $0x70] sm:$0xff] %v1464_v12  ;;  %v1465_v52 = vadd.f32 %v2662_v23, %v1280_v25  ;;  %v1438_v19 = vpop.f32.mrb[15].mxu1  ;;  %v1510_v32 = vld [vmem:[#allocation4 + $0x40] sm:$0xff] (!%p2482_p4)  ;;  %2727 = vmatprep.subr.bf16.mxu0 (!%p2482_p4), %v3041_v5 }
 0x446   : > { %1478 = vst [vmem:[#allocation4 + $0x60] sm:$0xff] %v1462_v14  ;;  %v1463_v26 = vadd.f32 %v1438_v19, %v1278_v40  ;;  %2698 = vmatpush3.bf16.msra.mxu1 (!%p2482_p4), %v3034_v62  ;;  %v1507_v14 = vld [vmem:[#allocation4 + $0x28] sm:$0xff] (!%p2482_p4)  ;;  %v1513_v16 = vld [vmem:[#allocation4 + $0x58] sm:$0xff] (!%p2482_p4) }
 0x447   : > { %1481 = vst [vmem:[#allocation4 + $0x78] sm:$0xff] %v1465_v52  ;;  %1617 = vperm.xlu1 (!%p2482_p4), %3024, %v3074_v44   ;;  %2699 = vmatprep.subr.bf16.mxu1 (!%p2482_p4), %v3035_v29  ;;  %v1506_v52 = vld [vmem:[#allocation4 + $0x20] sm:$0xff] (!%p2482_p4)  ;;  %v1511_v54 = vld [vmem:[#allocation4 + $0x48] sm:$0xff] (!%p2482_p4) }
 0x448   : > { %1479 = vst [vmem:[#allocation4 + $0x68] sm:$0xff] %v1463_v26  ;;  %1612 = vperm.xlu0 (!%p2482_p4), %3023, %v3076_v60   ;;  %v3042_v62 = vld [vmem:[#allocation16 + $0x8] sm:$0xff] (!%p2482_p4)  }
 0x44a   : > { %2700 = vmatpush3.bf16.msra.mxu1 %v3035_v29  ;;  %v4326_v29 = vld [vmem:[#allocation16 + $0x10] sm:$0xff]  }
 0x44b   : > { %1627 = vperm.xlu1 %3024, %v3078_v15   ;;  %2701 = vmatprep.subr.bf16.mxu1 %v3036_v63  ;;  %v3039_v15 = vld [vmem:[#allocation14 + $0x30] sm:$0xff]  }
 0x44c   : > { %1622 = vperm.xlu0 %3023, %v3080_v59   ;;  %v1516_v43 = vld [vmem:[#allocation4 + $0x70] sm:$0xff]  ;;  %v3040_v59 = vld [vmem:[#allocation14 + $0x38] sm:$0xff]  }
 0x44d   : > { %v1514_v9 = vld [vmem:[#allocation4 + $0x60] sm:$0xff] }
 0x44e   : > { %2702 = vmatpush3.bf16.msra.mxu1 %v3036_v63  ;;  %v1517_v58 = vld [vmem:[#allocation4 + $0x78] sm:$0xff] }
 0x44f   : > { %2703 = vmatprep.subr.bf16.mxu1 %v3037_v1  ;;  %v1515_v22 = vld [vmem:[#allocation4 + $0x68] sm:$0xff]  ;;  %v4329_v63 = vld [vmem:[#allocation16 + $0x18] sm:$0xff]  }
 0x452   : > { %2704 = vmatpush3.bf16.msra.mxu1 %v3037_v1  ;;  %v4333_v1 = vld [vmem:[#allocation16 + $0x20] sm:$0xff]  }
 0x453   : > { %2705 = vmatprep.subr.bf16.mxu1 %v3038_v28 }
 0x456   : > { %2706 = vmatpush3.bf16.msra.mxu1 %v3038_v28  ;;  %v4337_v28 = vld [vmem:[#allocation16 + $0x28] sm:$0xff]  }
 0x457   : > { %2707 = vmatprep.subr.bf16.mxu1 %v3039_v15 }
 0x45a   : > { %2708 = vmatpush3.bf16.msra.mxu1 %v3039_v15 }
 0x45b   : > { %2709 = vmatprep.subr.bf16.mxu1 %v3040_v59 }
 0x45e   : > { %2710 = vmatpush3.bf16.msra.mxu1 %v3040_v59 }
 0x45f   : > { %2759 = vmatprep.subr.bf16.mxu1 %v3041_v5 }
 0x4ae   : > { %v1563_v39 = vpop.permute.xlu1 %1562 }
 0x4af   : > { %v1553_v3 = vpop.permute.xlu0 %1552  ;;  %v1632_v37 = vmul.f32 %v1563_v39, %v1504_v47  ;;  %v4345_v39 = vld [vmem:[%s4572_s16] ss:$0 sm:$0xff] }
 0x4b0   : > { %v1630_v34 = vmul.f32 %v1553_v3, %v1502_v36  ;;  %v1824_v36 = vld [vmem:[%s3909_s11 + $0x10] sm:$0xff] }
 0x4b2   : > { %v1568_v18 = vpop.permute.xlu1 %1567 }
 0x4b3   : > { %v1633_v25 = vmul.f32 %v1568_v18, %v1505_v48  ;;  %v1558_v12 = vpop.permute.xlu0 %1557 }
 0x4b4   : > { %v1631_v40 = vmul.f32 %v1558_v12, %v1503_v46 }
 0x4b5   : > { %v1647_v23 = vpack.c.bf16 %v1633_v25, %v1632_v37  ;;  %v1825_v37 = vld [vmem:[%s3909_s11 + $0x18] sm:$0xff] }
 0x4b6   : > { %v1578_v19 = vpop.permute.xlu1 %1577  ;;  %v1646_v26 = vpack.c.bf16 %v1631_v40, %v1630_v34  ;;  %v1822_v34 = vld [vmem:[%s3909_s11] sm:$0xff]  ;;  %v1823_v40 = vld [vmem:[%s3909_s11 + $0x8] sm:$0xff] }
 0x4b7   : > { %v1635_v56 = vmul.f32 %v1578_v19, %v1507_v14  ;;  %v1573_v30 = vpop.permute.xlu0 %1572 }
 0x4b8   : > { %v1634_v4 = vmul.f32 %v1573_v30, %v1506_v52  ;;  %2679 = vmatprep.mubr.bf16.mxu0 %v1646_v26 }
 0x4b9   : > { %2680 = vmatmul.mubr.bf16.vlgmr.msra.gmra.mrb[0].mxu0 %v1647_v23 }
 0x4ba   : > { %v1648_v45 = vpack.c.bf16 %v1635_v56, %v1634_v4  ;;  %v1588_v38 = vpop.permute.xlu1 %1587  ;;  %2728 = vmatpush3.bf16.msra.mxu0 %v3041_v5 }
 0x4bb   : > { %v1637_v50 = vmul.f32 %v1588_v38, %v1509_v20  ;;  %v1583_v8 = vpop.permute.xlu0 %1582  ;;  %2729 = vmatprep.subr.bf16.mxu0 %v3042_v62 }
 0x4bc   : > { %v1636_v33 = vmul.f32 %v1583_v8, %v1508_v51  ;;  %2683 = vmatprep.mubr.bf16.mxu0 %v1648_v45  ;;  %v1828_v45 = vld [vmem:[%s3909_s11 + $0x30] sm:$0xff]  ;;  %v1829_v8 = vld [vmem:[%s3909_s11 + $0x38] sm:$0xff] }
 0x4be   : > { %v1649_v2 = vpack.c.bf16 %v1637_v50, %v1636_v33  ;;  %v1598_v35 = vpop.permute.xlu1 %1597  ;;  %2730 = vmatpush3.bf16.msra.mxu0 %v3042_v62  ;;  %v1826_v33 = vld [vmem:[%s3909_s11 + $0x20] sm:$0xff] }
 0x4bf   : > { %v1639_v6 = vmul.f32 %v1598_v35, %v1511_v54  ;;  %v1593_v55 = vpop.permute.xlu0 %1592  ;;  %2731 = vmatprep.subr.bf16.mxu0 %v4326_v29 }
 0x4c0   : > { %v1638_v21 = vmul.f32 %v1593_v55, %v1510_v32 }
 0x4c1   : > { %2684 = vmatmul.mubr.bf16.gmra.mrb[4].mxu0 %v1649_v2  ;;  %v1827_v2 = vld [vmem:[%s3909_s11 + $0x28] sm:$0xff] }
 0x4c2   : > { %v1650_v42 = vpack.c.bf16 %v1639_v6, %v1638_v21  ;;  %v1608_v31 = vpop.permute.xlu1 %1607  ;;  %2732 = vmatpush3.bf16.msra.mxu0 %v4326_v29 }
 0x4c3   : > { %v1641_v27 = vmul.f32 %v1608_v31, %v1513_v16  ;;  %v1603_v0 = vpop.permute.xlu0 %1602  ;;  %2733 = vmatprep.subr.bf16.mxu0 %v4329_v63 }
 0x4c4   : > { %v1640_v61 = vmul.f32 %v1603_v0, %v1512_v57  ;;  %2687 = vmatprep.mubr.bf16.mxu0 %v1650_v42 }
 0x4c6   : > { %v1651_v13 = vpack.c.bf16 %v1641_v27, %v1640_v61  ;;  %v1618_v11 = vpop.permute.xlu1 %1617  ;;  %2734 = vmatpush3.bf16.msra.mxu0 %v4329_v63  ;;  %v1832_v61 = vld [vmem:[%s3909_s11 + $0x50] sm:$0xff] }
 0x4c7   : > { %v1643_v7 = vmul.f32 %v1618_v11, %v1515_v22  ;;  %v1613_v53 = vpop.permute.xlu0 %1612  ;;  %2735 = vmatprep.subr.bf16.mxu0 %v4333_v1  ;;  %v1830_v11 = vld [vmem:[%s3909_s11 + $0x40] sm:$0xff] }
 0x4c8   : > { %v1642_v10 = vmul.f32 %v1613_v53, %v1514_v9 }
 0x4c9   : > { %2688 = vmatmul.mubr.bf16.gmra.mrb[8].mxu0 %v1651_v13  ;;  %v1833_v13 = vld [vmem:[%s3909_s11 + $0x58] sm:$0xff] }
 0x4ca   : > { %v1652_v17 = vpack.c.bf16 %v1643_v7, %v1642_v10  ;;  %v1628_v24 = vpop.permute.xlu1 %1627  ;;  %2736 = vmatpush3.bf16.msra.mxu0 %v4333_v1  ;;  %v1831_v10 = vld [vmem:[%s3909_s11 + $0x48] sm:$0xff] }
 0x4cb   : > { %v1645_v41 = vmul.f32 %v1628_v24, %v1517_v58  ;;  %v1623_v49 = vpop.permute.xlu0 %1622  ;;  %2737 = vmatprep.subr.bf16.mxu0 %v4337_v28 }
 0x4cc   : > { %v1644_v44 = vmul.f32 %v1623_v49, %v1516_v43  ;;  %2691 = vmatprep.mubr.bf16.mxu0 %v1652_v17 }
 0x4ce   : > { %v1653_v60 = vpack.c.bf16 %v1645_v41, %v1644_v44  ;;  %2738 = vmatpush3.bf16.msra.mxu0 %v4337_v28 }
 0x4d1   : > { %2692 = vmatmul.mubr.bf16.gmra.mrb[12].mxu0 %v1653_v60 }
 0x58c   : > { %v2681_v3 = vpop.f32.mrb[0].mxu0 }
 0x58d   : > { %v1768_v47 = vadd.f32 %v2681_v3, %v4345_v39  ;;  %v1759_v48 = vpop.f32.mrb[1].mxu0  ;;  %v1837_v3 = vld [vmem:[%s3909_s11 + $0x78] sm:$0xff] }
 0x58e   : > { %v1760_v46 = vadd.f32 %v4345_v39, %v1759_v48  ;;  %v2682_v18 = vpop.f32.mrb[2].mxu0 }
 0x58f   : > { %v1771_v25 = vadd.f32 %v2682_v18, %v4345_v39  ;;  %v1762_v12 = vpop.f32.mrb[3].mxu0  ;;  %v1840_v23 = vadd.f32 %v1824_v36, %v1768_v47  ;;  %v1834_v47 = vld [vmem:[%s3909_s11 + $0x60] sm:$0xff] }
 0x590   : > { %v1763_v14 = vadd.f32 %v4345_v39, %v1762_v12  ;;  %v1838_v19 = vadd.f32 %v1822_v34, %v1760_v46  ;;  %v1835_v46 = vld [vmem:[%s3909_s11 + $0x68] sm:$0xff] }
 0x591   : > { %v1841_v52 = vadd.f32 %v1825_v37, %v1771_v25 }
 0x592   : > { %v1839_v26 = vadd.f32 %v1823_v40, %v1763_v14  ;;  %v3047_v14 = vld [vmem:[#allocation16 + $0x30] sm:$0xff]  }
 0x593   : > { %v1855_v56 = vpack.c.bf16 %v1841_v52, %v1840_v23  ;;  %2739 = vmatprep.subr.bf16.mxu0 %v3047_v14 }
 0x594   : > { %v2685_v30 = vpop.f32.mrb[4].mxu0  ;;  %v1854_v4 = vpack.c.bf16 %v1839_v26, %v1838_v19  ;;  %2740 = vmatpush3.bf16.msra.mxu0 %v3047_v14 }
 0x595   : > { %v1784_v20 = vadd.f32 %v2685_v30, %v4345_v39  ;;  %v1775_v51 = vpop.f32.mrb[5].mxu0 }
 0x596   : > { %v1776_v38 = vadd.f32 %v4345_v39, %v1775_v51  ;;  %v2686_v50 = vpop.f32.mrb[6].mxu0  ;;  %2711 = vmatprep.mubr.bf16.mxu1 %v1854_v4 }
 0x597   : > { %v1787_v54 = vadd.f32 %v2686_v50, %v4345_v39  ;;  %v1778_v32 = vpop.f32.mrb[7].mxu0  ;;  %2712 = vmatmul.mubr.bf16.vlgmr.msra.gmra.mrb[0].mxu1 %v1855_v56  ;;  %v1844_v6 = vadd.f32 %v1828_v45, %v1784_v20 }
 0x598   : > { %v1779_v35 = vadd.f32 %v4345_v39, %v1778_v32  ;;  %2767 = vmatpush3.bf16.msra.mxu1 %v3041_v5  ;;  %v1842_v21 = vadd.f32 %v1826_v33, %v1776_v38  ;;  %v1836_v5 = vld [vmem:[%s3909_s11 + $0x70] sm:$0xff] }
 0x599   : > { %v1845_v55 = vadd.f32 %v1829_v8, %v1787_v54  ;;  %2760 = vmatprep.subr.bf16.mxu1 %v3042_v62 }
 0x59a   : > { %v1843_v16 = vadd.f32 %v1827_v2, %v1779_v35 }
 0x59b   : > { %v1857_v57 = vpack.c.bf16 %v1845_v55, %v1844_v6 }
 0x59c   : > { %v2689_v42 = vpop.f32.mrb[8].mxu0  ;;  %v1856_v31 = vpack.c.bf16 %v1843_v16, %v1842_v21  ;;  %2768 = vmatpush3.bf16.msra.mxu1 %v3042_v62 }
 0x59d   : > { %v1800_v27 = vadd.f32 %v2689_v42, %v4345_v39  ;;  %v1791_v0 = vpop.f32.mrb[9].mxu0  ;;  %2761 = vmatprep.subr.bf16.mxu1 %v4326_v29 }
 0x59e   : > { %v1792_v22 = vadd.f32 %v4345_v39, %v1791_v0  ;;  %v2690_v9 = vpop.f32.mrb[10].mxu0  ;;  %2715 = vmatprep.mubr.bf16.mxu1 %v1856_v31 }
 0x59f   : > { %v1803_v7 = vadd.f32 %v2690_v9, %v4345_v39  ;;  %v1794_v53 = vpop.f32.mrb[11].mxu0  ;;  %2716 = vmatmul.mubr.bf16.gmra.mrb[4].mxu1 %v1857_v57  ;;  %v1848_v43 = vadd.f32 %v1832_v61, %v1800_v27 }
 0x5a0   : > { %v1795_v58 = vadd.f32 %v4345_v39, %v1794_v53  ;;  %2769 = vmatpush3.bf16.msra.mxu1 %v4326_v29  ;;  %v1846_v24 = vadd.f32 %v1830_v11, %v1792_v22 }
 0x5a1   : > { %v1849_v17 = vadd.f32 %v1833_v13, %v1803_v7  ;;  %2762 = vmatprep.subr.bf16.mxu1 %v4329_v63 }
 0x5a2   : > { %v1847_v41 = vadd.f32 %v1831_v10, %v1795_v58 }
 0x5a3   : > { %v1859_v49 = vpack.c.bf16 %v1849_v17, %v1848_v43 }
 0x5a4   : > { %v2693_v44 = vpop.f32.mrb[12].mxu0  ;;  %v1858_v60 = vpack.c.bf16 %v1847_v41, %v1846_v24  ;;  %2770 = vmatpush3.bf16.msra.mxu1 %v4329_v63 }
 0x5a5   : > { %v1816_v15 = vadd.f32 %v2693_v44, %v4345_v39  ;;  %v1807_v59 = vpop.f32.mrb[13].mxu0  ;;  %2763 = vmatprep.subr.bf16.mxu1 %v4333_v1 }
 0x5a6   : > { %v1808_v62 = vadd.f32 %v4345_v39, %v1807_v59  ;;  %v2694_v29 = vpop.f32.mrb[14].mxu0  ;;  %2719 = vmatprep.mubr.bf16.mxu1 %v1858_v60 }
 0x5a7   : > { %v1819_v48 = vadd.f32 %v2694_v29, %v4345_v39  ;;  %v1810_v36 = vpop.f32.mrb[15].mxu0  ;;  %2720 = vmatmul.mubr.bf16.gmra.mrb[8].mxu1 %v1859_v49  ;;  %v1852_v63 = vadd.f32 %v1836_v5, %v1816_v15 }
 0x5a8   : > { %v1811_v18 = vadd.f32 %v4345_v39, %v1810_v36  ;;  %2771 = vmatpush3.bf16.msra.mxu1 %v4333_v1  ;;  %v1850_v25 = vadd.f32 %v1834_v47, %v1808_v62  ;;  %v3048_v39 = vld [vmem:[#allocation16 + $0x38] sm:$0xff]   ;;  %v2492_v1 = vld [vmem:[%s4573_s5] ss:$0 sm:$0xff] }
 0x5a9   : > { %v1853_v37 = vadd.f32 %v1837_v3, %v1819_v48  ;;  %2764 = vmatprep.subr.bf16.mxu1 %v4337_v28  ;;  %2741 = vmatprep.subr.bf16.mxu0 %v3048_v39 }
 0x5aa   : > { %v1851_v12 = vadd.f32 %v1835_v46, %v1811_v18  ;;  %2742 = vmatpush3.bf16.msra.mxu0 %v3048_v39 }
 0x5ab   : > { %v1861_v34 = vpack.c.bf16 %v1853_v37, %v1852_v63  ;;  %v2501_v37 = vld [vmem:[%s4574_s10] ss:$0 sm:$0xff] }
 0x5ac   : > { %v1860_v40 = vpack.c.bf16 %v1851_v12, %v1850_v25  ;;  %2772 = vmatpush3.bf16.msra.mxu1 %v4337_v28 }
 0x5ad   : > { %2765 = vmatprep.subr.bf16.mxu1 %v3047_v14 }
 0x5ae   : > { %2723 = vmatprep.mubr.bf16.mxu1 %v1860_v40 }
 0x5af   : > { %2724 = vmatmul.mubr.bf16.gmra.mrb[12].mxu1 %v1861_v34 }
 0x5b0   : > { %2773 = vmatpush3.bf16.msra.mxu1 %v3047_v14 }
 0x5b1   : > { %2766 = vmatprep.subr.bf16.mxu1 %v3048_v39 }
 0x5b4   : > { %2774 = vmatpush3.bf16.msra.mxu1 %v3048_v39 }
 0x66a   : > { %v2713_v23 = vpop.f32.mrb[0].mxu1 }
 0x66b   : > { %v1976_v52 = vadd.f32 %v2713_v23, %v2492_v1  ;;  %v1967_v19 = vpop.f32.mrb[1].mxu1 }
 0x66c   : > { %v1968_v28 = vadd.f32 %v2492_v1, %v1967_v19  ;;  %v2714_v26 = vpop.f32.mrb[2].mxu1 }
 0x66d   : > { %v1979_v56 = vadd.f32 %v2714_v26, %v2492_v1  ;;  %v1970_v30 = vpop.f32.mrb[3].mxu1  ;;  %v2032_v20 = vmax.f32 %v1976_v52, 0.0 }
 0x66e   : > { %v1971_v4 = vadd.f32 %v2492_v1, %v1970_v30  ;;  %v2030_v45 = vmax.f32 %v1968_v28, 0.0 }
 0x66f   : > { %v2033_v51 = vmax.f32 %v1979_v56, 0.0 }
 0x670   : > { %v2031_v38 = vmax.f32 %v1971_v4, 0.0 }
 0x671   : > { %v2047_v50 = vpack.c.bf16 %v2033_v51, %v2032_v20 }
 0x672   : > { %v2046_v8 = vpack.c.bf16 %v2031_v38, %v2030_v45  ;;  %v2717_v33 = vpop.f32.mrb[4].mxu1 }
 0x673   : > { %v1992_v54 = vadd.f32 %v2717_v33, %v2492_v1  ;;  %v1983_v32 = vpop.f32.mrb[5].mxu1 }
 0x674   : > { %v1984_v2 = vadd.f32 %v2492_v1, %v1983_v32  ;;  %v2718_v35 = vpop.f32.mrb[6].mxu1  ;;  %2743 = vmatprep.mubr.bf16.mxu0 %v2046_v8 }
 0x675   : > { %v1995_v6 = vadd.f32 %v2718_v35, %v2492_v1  ;;  %v1986_v55 = vpop.f32.mrb[7].mxu1  ;;  %2744 = vmatmul.mubr.bf16.vlgmr.msra.gmra.mrb[16].mxu0 %v2047_v50  ;;  %v2036_v16 = vmax.f32 %v1992_v54, 0.0 }
 0x676   : > { %v1987_v21 = vadd.f32 %v2492_v1, %v1986_v55  ;;  %v2034_v42 = vmax.f32 %v1984_v2, 0.0 }
 0x677   : > { %v2037_v57 = vmax.f32 %v1995_v6, 0.0 }
 0x678   : > { %v2035_v31 = vmax.f32 %v1987_v21, 0.0 }
 0x679   : > { %v2049_v27 = vpack.c.bf16 %v2037_v57, %v2036_v16 }
 0x67a   : > { %v2048_v0 = vpack.c.bf16 %v2035_v31, %v2034_v42  ;;  %v2721_v61 = vpop.f32.mrb[8].mxu1 }
 0x67b   : > { %v2008_v22 = vadd.f32 %v2721_v61, %v2492_v1  ;;  %v1999_v9 = vpop.f32.mrb[9].mxu1 }
 0x67c   : > { %v2000_v13 = vadd.f32 %v2492_v1, %v1999_v9  ;;  %v2722_v11 = vpop.f32.mrb[10].mxu1  ;;  %2747 = vmatprep.mubr.bf16.mxu0 %v2048_v0 }
 0x67d   : > { %v2011_v7 = vadd.f32 %v2722_v11, %v2492_v1  ;;  %v2002_v53 = vpop.f32.mrb[11].mxu1  ;;  %2748 = vmatmul.mubr.bf16.gmra.mrb[20].mxu0 %v2049_v27  ;;  %v2040_v58 = vmax.f32 %v2008_v22, 0.0 }
 0x67e   : > { %v2003_v10 = vadd.f32 %v2492_v1, %v2002_v53  ;;  %v2038_v17 = vmax.f32 %v2000_v13, 0.0 }
 0x67f   : > { %v2041_v43 = vmax.f32 %v2011_v7, 0.0 }
 0x680   : > { %v2039_v24 = vmax.f32 %v2003_v10, 0.0 }
 0x681   : > { %v2051_v41 = vpack.c.bf16 %v2041_v43, %v2040_v58 }
 0x682   : > { %v2050_v49 = vpack.c.bf16 %v2039_v24, %v2038_v17  ;;  %v2725_v44 = vpop.f32.mrb[12].mxu1 }
 0x683   : > { %v2024_v60 = vadd.f32 %v2725_v44, %v2492_v1  ;;  %v2015_v15 = vpop.f32.mrb[13].mxu1 }
 0x684   : > { %v2016_v59 = vadd.f32 %v2492_v1, %v2015_v15  ;;  %v2726_v5 = vpop.f32.mrb[14].mxu1  ;;  %2751 = vmatprep.mubr.bf16.mxu1 %v2050_v49 }
 0x685   : > { %v2027_v62 = vadd.f32 %v2726_v5, %v2492_v1  ;;  %v2018_v29 = vpop.f32.mrb[15].mxu1  ;;  %2752 = vmatmul.mubr.bf16.vlgmr.msra.gmra.mrb[16].mxu1 %v2051_v41  ;;  %v2044_v47 = vmax.f32 %v2024_v60, 0.0 }
 0x686   : > { %v2019_v3 = vadd.f32 %v2492_v1, %v2018_v29  ;;  %v2042_v36 = vmax.f32 %v2016_v59, 0.0 }
 0x687   : > { %v2045_v48 = vmax.f32 %v2027_v62, 0.0 }
 0x688   : > { %v2043_v46 = vmax.f32 %v2019_v3, 0.0 }
 0x689   : > { %v2053_v18 = vpack.c.bf16 %v2045_v48, %v2044_v47 }
 0x68a   : > { %v2052_v63 = vpack.c.bf16 %v2043_v46, %v2042_v36 }
 0x68c   : > { %2755 = vmatprep.mubr.bf16.mxu1 %v2052_v63 }
 0x68d   : > { %2756 = vmatmul.mubr.bf16.gmra.mrb[20].mxu1 %v2053_v18 }
 0x748   : > { %v2745_v25 = vpop.f32.mrb[16].mxu0 }
 0x749   : > { %v2168_v12 = vadd.f32 %v2745_v25, %v2501_v37  ;;  %v2159_v34 = vpop.f32.mrb[17].mxu0 }
 0x74a   : > { %v2160_v40 = vadd.f32 %v2501_v37, %v2159_v34  ;;  %v2746_v14 = vpop.f32.mrb[18].mxu0 }
 0x74b   : > { %2224 = vst [vmem:[%s3923_s27 + $0x10] sm:$0xff] %v2168_v12  ;;  %v2171_v39 = vadd.f32 %v2746_v14, %v2501_v37  ;;  %v2162_v1 = vpop.f32.mrb[19].mxu0 }
 0x74c   : > { %2222 = vst [vmem:[%s3923_s27] sm:$0xff] %v2160_v40  ;;  %v2163_v23 = vadd.f32 %v2501_v37, %v2162_v1 }
 0x74d   : > { %2225 = vst [vmem:[%s3923_s27 + $0x18] sm:$0xff] %v2171_v39 }
 0x74e   : > { %2223 = vst [vmem:[%s3923_s27 + $0x8] sm:$0xff] %v2163_v23 }
 0x750   : > { %v2749_v52 = vpop.f32.mrb[20].mxu0 }
 0x751   : > { %v2184_v19 = vadd.f32 %v2749_v52, %v2501_v37  ;;  %v2175_v28 = vpop.f32.mrb[21].mxu0 }
 0x752   : > { %v2176_v26 = vadd.f32 %v2501_v37, %v2175_v28  ;;  %v2750_v56 = vpop.f32.mrb[22].mxu0 }
 0x753   : > { %2228 = vst [vmem:[%s3923_s27 + $0x30] sm:$0xff] %v2184_v19  ;;  %v2187_v30 = vadd.f32 %v2750_v56, %v2501_v37  ;;  %v2178_v4 = vpop.f32.mrb[23].mxu0 }
 0x754   : > { %2226 = vst [vmem:[%s3923_s27 + $0x20] sm:$0xff] %v2176_v26  ;;  %v2179_v20 = vadd.f32 %v2501_v37, %v2178_v4 }
 0x755   : > { %2229 = vst [vmem:[%s3923_s27 + $0x38] sm:$0xff] %v2187_v30 }
 0x756   : > { %2227 = vst [vmem:[%s3923_s27 + $0x28] sm:$0xff] %v2179_v20 }
 0x758   : > { %v2753_v51 = vpop.f32.mrb[16].mxu1 }
 0x759   : > { %v2200_v45 = vadd.f32 %v2753_v51, %v2501_v37  ;;  %v2191_v38 = vpop.f32.mrb[17].mxu1 }
 0x75a   : > { %v2192_v50 = vadd.f32 %v2501_v37, %v2191_v38  ;;  %v2754_v8 = vpop.f32.mrb[18].mxu1 }
 0x75b   : > { %2232 = vst [vmem:[%s3923_s27 + $0x50] sm:$0xff] %v2200_v45  ;;  %v2203_v33 = vadd.f32 %v2754_v8, %v2501_v37  ;;  %v2194_v54 = vpop.f32.mrb[19].mxu1 }
 0x75c   : > { %2230 = vst [vmem:[%s3923_s27 + $0x40] sm:$0xff] %v2192_v50  ;;  %v2195_v32 = vadd.f32 %v2501_v37, %v2194_v54 }
 0x75d   : > { %2233 = vst [vmem:[%s3923_s27 + $0x58] sm:$0xff] %v2203_v33 }
 0x75e   : > { %2231 = vst [vmem:[%s3923_s27 + $0x48] sm:$0xff] %v2195_v32 }
 0x760   : > { %v2757_v2 = vpop.f32.mrb[20].mxu1 }
 0x761   : > { %v2216_v35 = vadd.f32 %v2757_v2, %v2501_v37  ;;  %v2207_v6 = vpop.f32.mrb[21].mxu1 }
 0x762   : > { %v2208_v55 = vadd.f32 %v2501_v37, %v2207_v6  ;;  %v2758_v21 = vpop.f32.mrb[22].mxu1 }
 0x763   : > { %2236 = vst [vmem:[%s3923_s27 + $0x70] sm:$0xff] %v2216_v35  ;;  %v2219_v16 = vadd.f32 %v2758_v21, %v2501_v37  ;;  %v2210_v57 = vpop.f32.mrb[23].mxu1 }
 0x764   : > { %2234 = vst [vmem:[%s3923_s27 + $0x60] sm:$0xff] %v2208_v55  ;;  %v2211_v42 = vadd.f32 %v2501_v37, %v2210_v57 }
 0x765   : > { %2237 = vst [vmem:[%s3923_s27 + $0x78] sm:$0xff] %v2219_v16 }
 0x766   : > { %2235 = vst [vmem:[%s3923_s27 + $0x68] sm:$0xff] %v2211_v42 }
 0x767 PF: > { %s4575_s30 = sld [smem:[#allocation28_spill]]  ;;  %s4576_s9 = sld [smem:[#allocation40_spill]] }
 0x768   : > { %s2252_s25 = sshll.u32 %s3923_s27, 4  ;;  %s2239_s24 = scalar_lea.sflag [#allocation7], %s3888_s7  ;;  %s4416_s25 = int_to_ptr.vmem [resolvable:$true] %s2252_s25 }
 0x769   : > { %s3285_s4 = scalar_lea.vmem %s4416_s25, 2048  ;;  %p4577_p8 = scmp.ne.s32.totalorder %s4551_s26, 0 }
 0x76a   : > { %p3286_p13 = scmp.ne.s32.totalorder %s4416_s25, %s3285_s4  ;;  %s3440_s28 = smov [#allocation17]  }
 0x76b   : > { %s3289_s16 = sshll.u32 %s3440_s28, 4  ;;  %s3290_s16 = int_to_ptr.vmem [resolvable:$false] %s3289_s16 }
 0x76c   : > { %p3287_p9 = pnand %p3286_p13, %p4577_p8  ;;  %s3291_s19 = scalar_lea.vmem %s3290_s16, 4096 }
 0x76d   : > { %s2518_s12 = sshll.u32 %s4575_s30, 11  ;;  %p3292_p1 = scmp.lt.s32.totalorder %s4416_s25, %s3290_s16 }
 0x76e   : > { %s4413_s11 = scalar_lea.hbm %s4576_s9, %s2518_s12  ;;  %p3288_p5 = pneg %p3287_p9 }
 0x76f   : > { %p3293_p12 = scmp.lt.s32.totalorder %s3291_s19, %s3285_s4 }
 0x771   : > { %p3294_p3 = por %p3293_p12, %p3292_p1 }
 0x773   : > { %p3295_p11 = pnand %p3294_p3, %p3288_p5 }
 0x775   : > { %3298 = shalt.err (!%p3295_p11)
}
 0x776   : > { %s3299_s27 = scalar_lea.hbm %s4413_s11, 2048  ;;  %s3303_s29 = scalar_lea.hbm %s4576_s9, 4096 }
 0x777   : > { %p3300_p10 = scmp.ne.s32.totalorder %s4413_s11, %s3299_s27  ;;  %p3304_p2 = scmp.lt.u32.totalorder %s4413_s11, %s4576_s9 }
 0x778   : > { %p3305_p7 = scmp.lt.u32.totalorder %s3303_s29, %s3299_s27  ;;  %p3307_p13 = scmp.lt.u32.totalorder %s3299_s27, %s4413_s11 }
 0x779   : > { %p3301_p0 = pnand %p3300_p10, %p4577_p8 }
 0x77a   : > { %p3306_p4 = por %p3305_p7, %p3304_p2 }
 0x77b   : > { %p3302_p6 = pneg %p3301_p0 }
 0x77c   : > { %p3308_p9 = por %p3307_p13, %p3306_p4 }
 0x77e   : > { %p3309_p5 = pnand %p3308_p9, %p3302_p6 }
 0x780   : > { %3312 = shalt.err (!%p3309_p5)
}
 0x781   : > { %s3441_s30 = smov 128   ;;  %s3442_s12 = smov 8  }
 0x782   : > { %2795 = dma.vmem_to_hbm [thread:$0]  (%p4577_p8), %s4416_s25, 2048, %s4413_s11, %s2239_s24, %s3441_s30, %s3441_s30, %s3442_s12  }
 0x783 PF: > { %s4578_s20 = sld [smem:[#allocation26_spill]]  ;;  %s4579_s6 = sld [smem:[#allocation31_spill]] }
 0x784   : > { %p2831_p1 = scmp.ge.s32.totalorder %s3423_s23, 2 }
 0x789   : > { %s2267_s4 = sand.u32 1, %s4578_s20   ;;  %p4580_p12 = scmp.ne.s32.totalorder %s4579_s6, 0 }
 0x78a   : > { %s2268_s28 = scalar_lea.sflag [#allocation7], %s2267_s4 }
 0x78b   : > { %p2821_p3 = pnand %p2831_p1, %p4580_p12 }
 0x78d   : > { %3378 = dma.done.wait (!%p2821_p3), %s2268_s28, 2048  }
 0x78e   : > { %3380 = vsyncadd (!%p2821_p3), %s2268_s28, 4294965248  ;;  %s33_s23 = sadd.s32 1, %s3423_s23   ;;  %s4581_s13 = sld [smem:[#allocation24_spill]] }
 0x78f   : > { %p30_p11 = scmp.ge.s32.totalorder %s33_s23, 6   ;;  %s4582_s16 = sld [smem:[#allocation25_spill]] }
 0x790   : > { %s4583_s19 = sld [smem:[#allocation33_spill]]  ;;  %s4584_s26 = smov %s3775_s14 }
 0x791   : > { %s4585_s7 = sld [smem:[#allocation32_spill]]  ;;  %s4586_s11 = smov %s4601_s15 }
 0x792   : > { %s4593_s20 = smov %s3419_s22  ;;  %s4595_s22 = smov %s4586_s11 }
 0x793   :  { %32 = sbr.rel (!%p30_p11) target bundleno = 22 (0x16), region = 162 }
 0x795   : > { %s4587_s14 = smov %s4582_s16  ;;  %s4589_s16 = smov %s3399_s17 }
 0x796   : > { %s4588_s15 = smov %s4583_s19  ;;  %s4590_s17 = smov %s3403_s18 }
 0x797   : > { %s4591_s18 = smov %s4584_s26  ;;  %s4592_s19 = smov %s3415_s21 }
 0x798   : > { %s4594_s21 = smov %s4585_s7 }
 0x79a   :  { %2273 = vsyncpa [#allocation6], 1 }
 0x79b   :  { %2275 = vsyncpa [#allocation6 + $0x1], 1 }
 0x79c   :  { %2276 = vsyncpa [#allocation9], 1 }
 0x79d   :  { %2278 = vsyncpa [#allocation9 + $0x1], 1 }
 0x79e   :  { %2279 = vsyncpa [#allocation12], 1 }
 0x79f   :  { %2281 = vsyncpa [#allocation12 + $0x1], 1 }
 0x7a0   :  { %2282 = vsyncpa [#allocation15], 1 }
 0x7a1   :  { %2283 = vsyncpa [#allocation7], 1 }
 0x7a2   :  { %2285 = vsyncpa [#allocation7 + $0x1], 1 }

</bundles_post_ra>
